<compile_context>
chip_gen: v7x
topology: tpu7x:2x2x1
jax: 0.10.0
libtpu: 0.0.40
codegen_flags: <defaults>
</compile_context>

<pallas_src>
import functools
import math

import jax
import jax.numpy as jnp
from jax.experimental import pallas as pl
from jax.experimental.pallas import tpu as pltpu

LN_EPS = 1e-5  # PyTorch LayerNorm default


# ----------------------------- in-kernel helpers ------------------------------------
def _layernorm(x, w, b):
    mu = jnp.mean(x, axis=-1, keepdims=True)
    var = jnp.mean((x - mu) ** 2, axis=-1, keepdims=True)
    return (x - mu) * jax.lax.rsqrt(var + LN_EPS) * w + b


def _gelu(x):
    # exact (erf-based) GELU, matching F.gelu default
    return 0.5 * x * (1.0 + jax.lax.erf(x * (1.0 / math.sqrt(2.0))))


# ----------------------------- fused per-sample kernel ------------------------------
def _tc_kernel(x_ref, pos_ref,
               ln0w_ref, ln0b_ref, wqkv_ref, wp_ref, pb_ref,
               ln1w_ref, ln1b_ref, fc1w_ref, fc1b_ref, fc2w_ref, fc2b_ref,
               normw_ref, normb_ref, poolw_ref, poolb_ref, fcw_ref, fcb_ref,
               o_ref, *, num_layers, num_heads):
    N, C = x_ref.shape                       # per-sample block (sequence_length, embedding_dim)
    H = num_heads
    dh = C // H

    # learnable positional embedding; dropout after it is identity (eval)
    x = x_ref[...] + pos_ref[...]            # (N, C)

    for l in range(num_layers):              # static unrolled layer loop, weights read once each
        # ---- self-attention (pre-norm) ----
        h = _layernorm(x, ln0w_ref[l], ln0b_ref[l])                                   # (N, C)
        # fused, lane-dense QKV projection; 1/sqrt(dh) already folded into the Q columns
        qkv = jnp.dot(h, wqkv_ref[l], preferred_element_type=jnp.float32)             # (N, 3C)
        q = qkv[:, 0 * C:1 * C].reshape(N, H, dh).transpose(1, 0, 2)                  # (H, N, dh)
        k = qkv[:, 1 * C:2 * C].reshape(N, H, dh).transpose(1, 0, 2)                  # (H, N, dh)
        v = qkv[:, 2 * C:3 * C].reshape(N, H, dh).transpose(1, 0, 2)                  # (H, N, dh)

        s = jnp.einsum('hqd,hkd->hqk', q, k, preferred_element_type=jnp.float32)      # (H, N, N)
        m = jnp.max(s, axis=-1, keepdims=True)
        e = jnp.exp(s - m)
        p = e * pl.reciprocal(jnp.sum(e, axis=-1, keepdims=True), approx=True)        # softmax
        o = jnp.einsum('hqk,hkd->hqd', p, v, preferred_element_type=jnp.float32)      # (H, N, dh)

        # concat heads -> (N, C), single output projection against the original (C, C) weight
        o = o.transpose(1, 0, 2).reshape(N, C)
        attn = jnp.dot(o, wp_ref[l], preferred_element_type=jnp.float32) + pb_ref[l]  # (N, C)

        # ---- residual (drop_path identity) + norm1 ----
        src = _layernorm(x + attn, ln1w_ref[l], ln1b_ref[l])

        # ---- feed-forward (dropouts identity) ----
        ff = jnp.dot(src, fc1w_ref[l], preferred_element_type=jnp.float32) + fc1b_ref[l]
        ff = _gelu(ff)
        ff = jnp.dot(ff, fc2w_ref[l], preferred_element_type=jnp.float32) + fc2b_ref[l]
        x = src + ff                                                                   # (N, C)

    # ---- classifier head (seq_pool=True), per-sample softmax over the sequence ----
    hN = _layernorm(x, normw_ref[...], normb_ref[...])                                 # (N, C)
    logit = jnp.dot(hN, poolw_ref[...], preferred_element_type=jnp.float32) + poolb_ref[...]  # (N,1)
    logit = logit - jnp.max(logit, axis=0, keepdims=True)                              # per-sample max
    e = jnp.exp(logit)                                                                 # (N, 1)
    numer = jnp.sum(e * hN, axis=0, keepdims=True)                                     # (1, C)
    denom = jnp.sum(e, axis=0, keepdims=True)                                          # (1, 1)
    pooled = numer * pl.reciprocal(denom, approx=True)                                 # (1, C)
    o_ref[...] = jnp.dot(pooled, fcw_ref[...], preferred_element_type=jnp.float32) + fcb_ref[...]


# ----------------------------- wrapper ----------------------------------------------
def transformer_classifier_forward(x, params, num_heads):
    B, N, C = x.shape
    L = params["fc1_w"].shape[0]
    NC = params["fc_w"].shape[1]

    kernel = functools.partial(_tc_kernel, num_layers=L, num_heads=num_heads)

    args = (x, params["pos_emb"],
            params["ln0_w"], params["ln0_b"],
            params["wqkv"], params["wp"], params["proj_b"],
            params["ln1_w"], params["ln1_b"],
            params["fc1_w"], params["fc1_b"], params["fc2_w"], params["fc2_b"],
            params["norm_w"], params["norm_b"],
            params["pool_w"], params["pool_b"], params["fc_w"], params["fc_b"])

    def const_spec(shape):
        nd = len(shape)
        return pl.BlockSpec(shape, lambda b, _nd=nd: (0,) * _nd)   # resident across grid steps

    in_specs = [pl.BlockSpec((None, N, C), lambda b: (b, 0, 0))]   # one sample per grid step
    in_specs += [const_spec(a.shape) for a in args[1:]]
    out_spec = pl.BlockSpec((None, 1, NC), lambda b: (b, 0, 0))

    out = pl.pallas_call(
        kernel,
        out_shape=jax.ShapeDtypeStruct((B, 1, NC), jnp.float32),
        grid=(B,),
        in_specs=in_specs,
        out_specs=out_spec,
        compiler_params=pltpu.CompilerParams(dimension_semantics=("parallel",)),
    )(*args)
    return out.reshape(B, NC)


# ----------------------------- deterministic parameter init -------------------------
def init_params(key, *, num_layers, seq_len, dim, ffn_dim, num_classes, num_heads):
    H = num_heads
    dh = dim // H

    def tn(k, shape, std):
        return (std * jax.random.truncated_normal(k, -2.0, 2.0, shape)).astype(jnp.float32)

    keys = iter(jax.random.split(key, 3 + 4 * num_layers))

    pos_emb = tn(next(keys), (seq_len, dim), 0.2)                 # (N, C)
    pool_w = tn(next(keys), (dim, 1), 0.02)                       # attention_pool
    fc_w = tn(next(keys), (dim, num_classes), 0.02)

    # scale folded into the Q columns of the fused qkv weight
    col_scale = jnp.concatenate([jnp.full((dim,), float(dh) ** -0.5, jnp.float32),
                                 jnp.ones((2 * dim,), jnp.float32)])[None, :]

    wqkv_l, wp_l, fc1w_l, fc2w_l = [], [], [], []
    for _ in range(num_layers):
        # qkv Linear(dim, 3*dim, bias=False), pre-transposed to (C, 3C); column order matches the
        # PyTorch reshape(B, N, 3, H, dh) split (q block first, head-major within each block).
        wqkv_l.append(tn(next(keys), (dim, 3 * dim), 0.02) * col_scale)
        # proj Linear(dim, dim) pre-transposed (C, C), lane-dense
        wp_l.append(tn(next(keys), (dim, dim), 0.02))
        fc1w_l.append(tn(next(keys), (dim, ffn_dim), 0.02))
        fc2w_l.append(tn(next(keys), (ffn_dim, dim), 0.02))

    L = num_layers
    params = {
        "pos_emb": pos_emb,
        "ln0_w": jnp.ones((L, 1, dim)), "ln0_b": jnp.zeros((L, 1, dim)),
        "wqkv": jnp.stack(wqkv_l),                                 # (L, C, 3C)
        "wp": jnp.stack(wp_l),                                     # (L, C, C)
        "proj_b": jnp.zeros((L, 1, dim)),
        "ln1_w": jnp.ones((L, 1, dim)), "ln1_b": jnp.zeros((L, 1, dim)),
        "fc1_w": jnp.stack(fc1w_l), "fc1_b": jnp.zeros((L, 1, ffn_dim)),
        "fc2_w": jnp.stack(fc2w_l), "fc2_b": jnp.zeros((L, 1, dim)),
        "norm_w": jnp.ones((1, dim)), "norm_b": jnp.zeros((1, dim)),
        "pool_w": pool_w, "pool_b": jnp.zeros((1, 1)),
        "fc_w": fc_w, "fc_b": jnp.zeros((1, num_classes)),
    }
    return jax.tree_util.tree_map(lambda a: a.astype(jnp.float32), params)


# ----------------------------- main --------------------------------------------------
if __name__ == "__main__":
    # small config consistent with the module:
    # seq_pool=True, embedding_dim=32, num_layers=2, num_heads=4, mlp_ratio=2.0,
    # num_classes=10, positional_embedding='learnable', sequence_length=8
    B, N, C = 2, 8, 32
    NUM_HEADS, NUM_LAYERS, FFN, NUM_CLASSES = 4, 2, 64, 10

    key = jax.random.PRNGKey(0)
    kx, kp = jax.random.split(key)
    x = jax.random.normal(kx, (B, N, C), dtype=jnp.float32)
    params = init_params(kp, num_layers=NUM_LAYERS, seq_len=N, dim=C,
                         ffn_dim=FFN, num_classes=NUM_CLASSES, num_heads=NUM_HEADS)

    out = transformer_classifier_forward(x, params, NUM_HEADS)
    out = jax.block_until_ready(out)
    assert out.shape == (B, NUM_CLASSES), out.shape
    assert bool(jnp.all(jnp.isfinite(out)))
    print("KERNEL_OK")
</pallas_src>

<mosaic_0001>
module attributes {stable_mosaic.version = 11 : i64} {
  func.func @_tc_kernel(%arg0: i32, %arg1: memref<1x8x32xf32, #tpu.memory_space<vmem>>, %arg2: memref<8x32xf32, #tpu.memory_space<vmem>>, %arg3: memref<2x1x32xf32, #tpu.memory_space<vmem>>, %arg4: memref<2x1x32xf32, #tpu.memory_space<vmem>>, %arg5: memref<2x32x96xf32, #tpu.memory_space<vmem>>, %arg6: memref<2x32x32xf32, #tpu.memory_space<vmem>>, %arg7: memref<2x1x32xf32, #tpu.memory_space<vmem>>, %arg8: memref<2x1x32xf32, #tpu.memory_space<vmem>>, %arg9: memref<2x1x32xf32, #tpu.memory_space<vmem>>, %arg10: memref<2x32x64xf32, #tpu.memory_space<vmem>>, %arg11: memref<2x1x64xf32, #tpu.memory_space<vmem>>, %arg12: memref<2x64x32xf32, #tpu.memory_space<vmem>>, %arg13: memref<2x1x32xf32, #tpu.memory_space<vmem>>, %arg14: memref<1x32xf32, #tpu.memory_space<vmem>>, %arg15: memref<1x32xf32, #tpu.memory_space<vmem>>, %arg16: memref<32x1xf32, #tpu.memory_space<vmem>>, %arg17: memref<1x1xf32, #tpu.memory_space<vmem>>, %arg18: memref<32x10xf32, #tpu.memory_space<vmem>>, %arg19: memref<1x10xf32, #tpu.memory_space<vmem>>, %arg20: memref<1x1x10xf32, #tpu.memory_space<vmem>>) attributes {dimension_semantics = [#tpu.dimension_semantics<parallel>], iteration_bounds = array<i64: 2>, scalar_prefetch = 0 : i64, scratch_operands = 0 : i64, tpu.core_type = #tpu.core_type<tc>, window_params = [{transform_indices = @transform_0, window_bounds = array<i64: 1, 8, 32>}, {pipeline_mode = #tpu.pipeline_mode<synchronous>, transform_indices = @transform_1, window_bounds = array<i64: 8, 32>}, {pipeline_mode = #tpu.pipeline_mode<synchronous>, transform_indices = @transform_2, window_bounds = array<i64: 2, 1, 32>}, {pipeline_mode = #tpu.pipeline_mode<synchronous>, transform_indices = @transform_3, window_bounds = array<i64: 2, 1, 32>}, {pipeline_mode = #tpu.pipeline_mode<synchronous>, transform_indices = @transform_4, window_bounds = array<i64: 2, 32, 96>}, {pipeline_mode = #tpu.pipeline_mode<synchronous>, transform_indices = @transform_5, window_bounds = array<i64: 2, 32, 32>}, {pipeline_mode = #tpu.pipeline_mode<synchronous>, transform_indices = @transform_6, window_bounds = array<i64: 2, 1, 32>}, {pipeline_mode = #tpu.pipeline_mode<synchronous>, transform_indices = @transform_7, window_bounds = array<i64: 2, 1, 32>}, {pipeline_mode = #tpu.pipeline_mode<synchronous>, transform_indices = @transform_8, window_bounds = array<i64: 2, 1, 32>}, {pipeline_mode = #tpu.pipeline_mode<synchronous>, transform_indices = @transform_9, window_bounds = array<i64: 2, 32, 64>}, {pipeline_mode = #tpu.pipeline_mode<synchronous>, transform_indices = @transform_10, window_bounds = array<i64: 2, 1, 64>}, {pipeline_mode = #tpu.pipeline_mode<synchronous>, transform_indices = @transform_11, window_bounds = array<i64: 2, 64, 32>}, {pipeline_mode = #tpu.pipeline_mode<synchronous>, transform_indices = @transform_12, window_bounds = array<i64: 2, 1, 32>}, {pipeline_mode = #tpu.pipeline_mode<synchronous>, transform_indices = @transform_13, window_bounds = array<i64: 1, 32>}, {pipeline_mode = #tpu.pipeline_mode<synchronous>, transform_indices = @transform_14, window_bounds = array<i64: 1, 32>}, {pipeline_mode = #tpu.pipeline_mode<synchronous>, transform_indices = @transform_15, window_bounds = array<i64: 32, 1>}, {pipeline_mode = #tpu.pipeline_mode<synchronous>, transform_indices = @transform_16, window_bounds = array<i64: 1, 1>}, {pipeline_mode = #tpu.pipeline_mode<synchronous>, transform_indices = @transform_17, window_bounds = array<i64: 32, 10>}, {pipeline_mode = #tpu.pipeline_mode<synchronous>, transform_indices = @transform_18, window_bounds = array<i64: 1, 10>}, {transform_indices = @transform_19, window_bounds = array<i64: 1, 1, 10>}]} {
    %c0 = arith.constant 0 : index
    %c0_0 = arith.constant 0 : index
    %c0_1 = arith.constant 0 : index
    %0 = vector.load %arg1[%c0, %c0_0, %c0_1] : memref<1x8x32xf32, #tpu.memory_space<vmem>>, vector<1x8x32xf32>
    %1 = vector.shape_cast %0 : vector<1x8x32xf32> to vector<8x32xf32>
    %c0_2 = arith.constant 0 : index
    %c0_3 = arith.constant 0 : index
    %2 = vector.load %arg2[%c0_2, %c0_3] : memref<8x32xf32, #tpu.memory_space<vmem>>, vector<8x32xf32>
    %3 = arith.addf %1, %2 : vector<8x32xf32>
    %c0_4 = arith.constant 0 : index
    %c0_5 = arith.constant 0 : index
    %c0_6 = arith.constant 0 : index
    %4 = vector.load %arg3[%c0_4, %c0_5, %c0_6] : memref<2x1x32xf32, #tpu.memory_space<vmem>>, vector<1x1x32xf32>
    %5 = vector.shape_cast %4 : vector<1x1x32xf32> to vector<1x32xf32>
    %c0_7 = arith.constant 0 : index
    %c0_8 = arith.constant 0 : index
    %c0_9 = arith.constant 0 : index
    %6 = vector.load %arg4[%c0_7, %c0_8, %c0_9] : memref<2x1x32xf32, #tpu.memory_space<vmem>>, vector<1x1x32xf32>
    %7 = vector.shape_cast %6 : vector<1x1x32xf32> to vector<1x32xf32>
    %cst = arith.constant dense<0.000000e+00> : vector<8xf32>
    %8 = vector.multi_reduction <add>, %3, %cst [1] : vector<8x32xf32> to vector<8xf32>
    %9 = vector.shape_cast %8 : vector<8xf32> to vector<8x1xf32>
    %cst_10 = arith.constant 3.200000e+01 : f32
    %10 = vector.broadcast %cst_10 : f32 to vector<8x1xf32>
    %11 = arith.divf %9, %10 : vector<8x1xf32>
    %12 = vector.broadcast %11 : vector<8x1xf32> to vector<8x32xf32>
    %13 = arith.subf %3, %12 : vector<8x32xf32>
    %14 = arith.mulf %13, %13 : vector<8x32xf32>
    %cst_11 = arith.constant dense<0.000000e+00> : vector<8xf32>
    %15 = vector.multi_reduction <add>, %14, %cst_11 [1] : vector<8x32xf32> to vector<8xf32>
    %16 = vector.shape_cast %15 : vector<8xf32> to vector<8x1xf32>
    %cst_12 = arith.constant 3.200000e+01 : f32
    %17 = vector.broadcast %cst_12 : f32 to vector<8x1xf32>
    %18 = arith.divf %16, %17 : vector<8x1xf32>
    %19 = vector.broadcast %11 : vector<8x1xf32> to vector<8x32xf32>
    %20 = arith.subf %3, %19 : vector<8x32xf32>
    %cst_13 = arith.constant 9.99999974E-6 : f32
    %21 = vector.broadcast %cst_13 : f32 to vector<8x1xf32>
    %22 = arith.addf %18, %21 : vector<8x1xf32>
    %23 = math.rsqrt %22 : vector<8x1xf32>
    %24 = vector.broadcast %23 : vector<8x1xf32> to vector<8x32xf32>
    %25 = arith.mulf %20, %24 : vector<8x32xf32>
    %26 = vector.broadcast %5 : vector<1x32xf32> to vector<8x32xf32>
    %27 = arith.mulf %25, %26 : vector<8x32xf32>
    %28 = vector.broadcast %7 : vector<1x32xf32> to vector<8x32xf32>
    %29 = arith.addf %27, %28 : vector<8x32xf32>
    %c0_14 = arith.constant 0 : index
    %c0_15 = arith.constant 0 : index
    %c0_16 = arith.constant 0 : index
    %30 = vector.load %arg5[%c0_14, %c0_15, %c0_16] : memref<2x32x96xf32, #tpu.memory_space<vmem>>, vector<1x32x96xf32>
    %31 = vector.shape_cast %30 : vector<1x32x96xf32> to vector<32x96xf32>
    %cst_17 = arith.constant dense<0.000000e+00> : vector<8x96xf32>
    %32 = tpu.matmul %29, %31, %cst_17 {dimension_numbers = #tpu.dot_dimension_numbers<[1], [0], [0], [1], [0, 0, 1, 1], [], []>} : vector<8x32xf32>, vector<32x96xf32>, vector<8x96xf32> -> vector<8x96xf32>
    %33 = vector.extract_strided_slice %32 {offsets = [0, 0], sizes = [8, 32], strides = [1, 1]} : vector<8x96xf32> to vector<8x32xf32>
    %34 = vector.shape_cast %33 : vector<8x32xf32> to vector<8x4x8xf32>
    %35 = tpu.transpose %34, [1, 0, 2] : vector<8x4x8xf32> -> vector<4x8x8xf32>
    %36 = vector.extract_strided_slice %32 {offsets = [0, 32], sizes = [8, 32], strides = [1, 1]} : vector<8x96xf32> to vector<8x32xf32>
    %37 = vector.shape_cast %36 : vector<8x32xf32> to vector<8x4x8xf32>
    %38 = tpu.transpose %37, [1, 0, 2] : vector<8x4x8xf32> -> vector<4x8x8xf32>
    %39 = vector.extract_strided_slice %32 {offsets = [0, 64], sizes = [8, 32], strides = [1, 1]} : vector<8x96xf32> to vector<8x32xf32>
    %40 = vector.shape_cast %39 : vector<8x32xf32> to vector<8x4x8xf32>
    %41 = tpu.transpose %40, [1, 0, 2] : vector<8x4x8xf32> -> vector<4x8x8xf32>
    "tpu.trace_start"() <{level = 10 : i32, message = "hqd,hkd->hqk"}> : () -> ()
    %cst_18 = arith.constant dense<0.000000e+00> : vector<4x8x8xf32>
    %42 = tpu.matmul %35, %38, %cst_18 {dimension_numbers = #tpu.dot_dimension_numbers<[2], [2], [1], [1], [0, 0, 0, 1, 1, 1], [0], [0]>} : vector<4x8x8xf32>, vector<4x8x8xf32>, vector<4x8x8xf32> -> vector<4x8x8xf32>
    "tpu.trace_stop"() : () -> ()
    %cst_19 = arith.constant dense<0xFF800000> : vector<4x8xf32>
    %43 = vector.multi_reduction <maximumf>, %42, %cst_19 [2] : vector<4x8x8xf32> to vector<4x8xf32>
    %44 = vector.shape_cast %43 : vector<4x8xf32> to vector<4x8x1xf32>
    %45 = vector.broadcast %44 : vector<4x8x1xf32> to vector<4x8x8xf32>
    %46 = arith.subf %42, %45 : vector<4x8x8xf32>
    %47 = math.exp %46 : vector<4x8x8xf32>
    %cst_20 = arith.constant dense<0.000000e+00> : vector<4x8xf32>
    %48 = vector.multi_reduction <add>, %47, %cst_20 [2] : vector<4x8x8xf32> to vector<4x8xf32>
    %49 = vector.shape_cast %48 : vector<4x8xf32> to vector<4x8x1xf32>
    %50 = tpu.reciprocal %49 {approx = true} : vector<4x8x1xf32> -> vector<4x8x1xf32>
    %51 = vector.broadcast %50 : vector<4x8x1xf32> to vector<4x8x8xf32>
    %52 = arith.mulf %47, %51 : vector<4x8x8xf32>
    "tpu.trace_start"() <{level = 10 : i32, message = "hqk,hkd->hqd"}> : () -> ()
    %cst_21 = arith.constant dense<0.000000e+00> : vector<4x8x8xf32>
    %53 = tpu.matmul %52, %41, %cst_21 {dimension_numbers = #tpu.dot_dimension_numbers<[2], [1], [1], [2], [0, 0, 0, 1, 1, 2], [0], [0]>} : vector<4x8x8xf32>, vector<4x8x8xf32>, vector<4x8x8xf32> -> vector<4x8x8xf32>
    "tpu.trace_stop"() : () -> ()
    %54 = tpu.transpose %53, [1, 0, 2] : vector<4x8x8xf32> -> vector<8x4x8xf32>
    %55 = vector.shape_cast %54 : vector<8x4x8xf32> to vector<8x32xf32>
    %c0_22 = arith.constant 0 : index
    %c0_23 = arith.constant 0 : index
    %c0_24 = arith.constant 0 : index
    %56 = vector.load %arg6[%c0_22, %c0_23, %c0_24] : memref<2x32x32xf32, #tpu.memory_space<vmem>>, vector<1x32x32xf32>
    %57 = vector.shape_cast %56 : vector<1x32x32xf32> to vector<32x32xf32>
    %cst_25 = arith.constant dense<0.000000e+00> : vector<8x32xf32>
    %58 = tpu.matmul %55, %57, %cst_25 {dimension_numbers = #tpu.dot_dimension_numbers<[1], [0], [0], [1], [0, 0, 1, 1], [], []>} : vector<8x32xf32>, vector<32x32xf32>, vector<8x32xf32> -> vector<8x32xf32>
    %c0_26 = arith.constant 0 : index
    %c0_27 = arith.constant 0 : index
    %c0_28 = arith.constant 0 : index
    %59 = vector.load %arg7[%c0_26, %c0_27, %c0_28] : memref<2x1x32xf32, #tpu.memory_space<vmem>>, vector<1x1x32xf32>
    %60 = vector.shape_cast %59 : vector<1x1x32xf32> to vector<1x32xf32>
    %61 = vector.broadcast %60 : vector<1x32xf32> to vector<8x32xf32>
    %62 = arith.addf %58, %61 : vector<8x32xf32>
    %63 = arith.addf %3, %62 : vector<8x32xf32>
    %c0_29 = arith.constant 0 : index
    %c0_30 = arith.constant 0 : index
    %c0_31 = arith.constant 0 : index
    %64 = vector.load %arg8[%c0_29, %c0_30, %c0_31] : memref<2x1x32xf32, #tpu.memory_space<vmem>>, vector<1x1x32xf32>
    %65 = vector.shape_cast %64 : vector<1x1x32xf32> to vector<1x32xf32>
    %c0_32 = arith.constant 0 : index
    %c0_33 = arith.constant 0 : index
    %c0_34 = arith.constant 0 : index
    %66 = vector.load %arg9[%c0_32, %c0_33, %c0_34] : memref<2x1x32xf32, #tpu.memory_space<vmem>>, vector<1x1x32xf32>
    %67 = vector.shape_cast %66 : vector<1x1x32xf32> to vector<1x32xf32>
    %cst_35 = arith.constant dense<0.000000e+00> : vector<8xf32>
    %68 = vector.multi_reduction <add>, %63, %cst_35 [1] : vector<8x32xf32> to vector<8xf32>
    %69 = vector.shape_cast %68 : vector<8xf32> to vector<8x1xf32>
    %cst_36 = arith.constant 3.200000e+01 : f32
    %70 = vector.broadcast %cst_36 : f32 to vector<8x1xf32>
    %71 = arith.divf %69, %70 : vector<8x1xf32>
    %72 = vector.broadcast %71 : vector<8x1xf32> to vector<8x32xf32>
    %73 = arith.subf %63, %72 : vector<8x32xf32>
    %74 = arith.mulf %73, %73 : vector<8x32xf32>
    %cst_37 = arith.constant dense<0.000000e+00> : vector<8xf32>
    %75 = vector.multi_reduction <add>, %74, %cst_37 [1] : vector<8x32xf32> to vector<8xf32>
    %76 = vector.shape_cast %75 : vector<8xf32> to vector<8x1xf32>
    %cst_38 = arith.constant 3.200000e+01 : f32
    %77 = vector.broadcast %cst_38 : f32 to vector<8x1xf32>
    %78 = arith.divf %76, %77 : vector<8x1xf32>
    %79 = vector.broadcast %71 : vector<8x1xf32> to vector<8x32xf32>
    %80 = arith.subf %63, %79 : vector<8x32xf32>
    %cst_39 = arith.constant 9.99999974E-6 : f32
    %81 = vector.broadcast %cst_39 : f32 to vector<8x1xf32>
    %82 = arith.addf %78, %81 : vector<8x1xf32>
    %83 = math.rsqrt %82 : vector<8x1xf32>
    %84 = vector.broadcast %83 : vector<8x1xf32> to vector<8x32xf32>
    %85 = arith.mulf %80, %84 : vector<8x32xf32>
    %86 = vector.broadcast %65 : vector<1x32xf32> to vector<8x32xf32>
    %87 = arith.mulf %85, %86 : vector<8x32xf32>
    %88 = vector.broadcast %67 : vector<1x32xf32> to vector<8x32xf32>
    %89 = arith.addf %87, %88 : vector<8x32xf32>
    %c0_40 = arith.constant 0 : index
    %c0_41 = arith.constant 0 : index
    %c0_42 = arith.constant 0 : index
    %90 = vector.load %arg10[%c0_40, %c0_41, %c0_42] : memref<2x32x64xf32, #tpu.memory_space<vmem>>, vector<1x32x64xf32>
    %91 = vector.shape_cast %90 : vector<1x32x64xf32> to vector<32x64xf32>
    %cst_43 = arith.constant dense<0.000000e+00> : vector<8x64xf32>
    %92 = tpu.matmul %89, %91, %cst_43 {dimension_numbers = #tpu.dot_dimension_numbers<[1], [0], [0], [1], [0, 0, 1, 1], [], []>} : vector<8x32xf32>, vector<32x64xf32>, vector<8x64xf32> -> vector<8x64xf32>
    %c0_44 = arith.constant 0 : index
    %c0_45 = arith.constant 0 : index
    %c0_46 = arith.constant 0 : index
    %93 = vector.load %arg11[%c0_44, %c0_45, %c0_46] : memref<2x1x64xf32, #tpu.memory_space<vmem>>, vector<1x1x64xf32>
    %94 = vector.shape_cast %93 : vector<1x1x64xf32> to vector<1x64xf32>
    %95 = vector.broadcast %94 : vector<1x64xf32> to vector<8x64xf32>
    %96 = arith.addf %92, %95 : vector<8x64xf32>
    %cst_47 = arith.constant 5.000000e-01 : f32
    %97 = vector.broadcast %cst_47 : f32 to vector<8x64xf32>
    %98 = arith.mulf %97, %96 : vector<8x64xf32>
    %cst_48 = arith.constant 0.707106769 : f32
    %99 = vector.broadcast %cst_48 : f32 to vector<8x64xf32>
    %100 = arith.mulf %96, %99 : vector<8x64xf32>
    %101 = math.erf %100 : vector<8x64xf32>
    %cst_49 = arith.constant 1.000000e+00 : f32
    %102 = vector.broadcast %cst_49 : f32 to vector<8x64xf32>
    %103 = arith.addf %102, %101 : vector<8x64xf32>
    %104 = arith.mulf %98, %103 : vector<8x64xf32>
    %c0_50 = arith.constant 0 : index
    %c0_51 = arith.constant 0 : index
    %c0_52 = arith.constant 0 : index
    %105 = vector.load %arg12[%c0_50, %c0_51, %c0_52] : memref<2x64x32xf32, #tpu.memory_space<vmem>>, vector<1x64x32xf32>
    %106 = vector.shape_cast %105 : vector<1x64x32xf32> to vector<64x32xf32>
    %cst_53 = arith.constant dense<0.000000e+00> : vector<8x32xf32>
    %107 = tpu.matmul %104, %106, %cst_53 {dimension_numbers = #tpu.dot_dimension_numbers<[1], [0], [0], [1], [0, 0, 1, 1], [], []>} : vector<8x64xf32>, vector<64x32xf32>, vector<8x32xf32> -> vector<8x32xf32>
    %c0_54 = arith.constant 0 : index
    %c0_55 = arith.constant 0 : index
    %c0_56 = arith.constant 0 : index
    %108 = vector.load %arg13[%c0_54, %c0_55, %c0_56] : memref<2x1x32xf32, #tpu.memory_space<vmem>>, vector<1x1x32xf32>
    %109 = vector.shape_cast %108 : vector<1x1x32xf32> to vector<1x32xf32>
    %110 = vector.broadcast %109 : vector<1x32xf32> to vector<8x32xf32>
    %111 = arith.addf %107, %110 : vector<8x32xf32>
    %112 = arith.addf %89, %111 : vector<8x32xf32>
    %c1 = arith.constant 1 : index
    %c0_57 = arith.constant 0 : index
    %c0_58 = arith.constant 0 : index
    %113 = vector.load %arg3[%c1, %c0_57, %c0_58] : memref<2x1x32xf32, #tpu.memory_space<vmem>>, vector<1x1x32xf32>
    %114 = vector.shape_cast %113 : vector<1x1x32xf32> to vector<1x32xf32>
    %c1_59 = arith.constant 1 : index
    %c0_60 = arith.constant 0 : index
    %c0_61 = arith.constant 0 : index
    %115 = vector.load %arg4[%c1_59, %c0_60, %c0_61] : memref<2x1x32xf32, #tpu.memory_space<vmem>>, vector<1x1x32xf32>
    %116 = vector.shape_cast %115 : vector<1x1x32xf32> to vector<1x32xf32>
    %cst_62 = arith.constant dense<0.000000e+00> : vector<8xf32>
    %117 = vector.multi_reduction <add>, %112, %cst_62 [1] : vector<8x32xf32> to vector<8xf32>
    %118 = vector.shape_cast %117 : vector<8xf32> to vector<8x1xf32>
    %cst_63 = arith.constant 3.200000e+01 : f32
    %119 = vector.broadcast %cst_63 : f32 to vector<8x1xf32>
    %120 = arith.divf %118, %119 : vector<8x1xf32>
    %121 = vector.broadcast %120 : vector<8x1xf32> to vector<8x32xf32>
    %122 = arith.subf %112, %121 : vector<8x32xf32>
    %123 = arith.mulf %122, %122 : vector<8x32xf32>
    %cst_64 = arith.constant dense<0.000000e+00> : vector<8xf32>
    %124 = vector.multi_reduction <add>, %123, %cst_64 [1] : vector<8x32xf32> to vector<8xf32>
    %125 = vector.shape_cast %124 : vector<8xf32> to vector<8x1xf32>
    %cst_65 = arith.constant 3.200000e+01 : f32
    %126 = vector.broadcast %cst_65 : f32 to vector<8x1xf32>
    %127 = arith.divf %125, %126 : vector<8x1xf32>
    %128 = vector.broadcast %120 : vector<8x1xf32> to vector<8x32xf32>
    %129 = arith.subf %112, %128 : vector<8x32xf32>
    %cst_66 = arith.constant 9.99999974E-6 : f32
    %130 = vector.broadcast %cst_66 : f32 to vector<8x1xf32>
    %131 = arith.addf %127, %130 : vector<8x1xf32>
    %132 = math.rsqrt %131 : vector<8x1xf32>
    %133 = vector.broadcast %132 : vector<8x1xf32> to vector<8x32xf32>
    %134 = arith.mulf %129, %133 : vector<8x32xf32>
    %135 = vector.broadcast %114 : vector<1x32xf32> to vector<8x32xf32>
    %136 = arith.mulf %134, %135 : vector<8x32xf32>
    %137 = vector.broadcast %116 : vector<1x32xf32> to vector<8x32xf32>
    %138 = arith.addf %136, %137 : vector<8x32xf32>
    %c1_67 = arith.constant 1 : index
    %c0_68 = arith.constant 0 : index
    %c0_69 = arith.constant 0 : index
    %139 = vector.load %arg5[%c1_67, %c0_68, %c0_69] : memref<2x32x96xf32, #tpu.memory_space<vmem>>, vector<1x32x96xf32>
    %140 = vector.shape_cast %139 : vector<1x32x96xf32> to vector<32x96xf32>
    %cst_70 = arith.constant dense<0.000000e+00> : vector<8x96xf32>
    %141 = tpu.matmul %138, %140, %cst_70 {dimension_numbers = #tpu.dot_dimension_numbers<[1], [0], [0], [1], [0, 0, 1, 1], [], []>} : vector<8x32xf32>, vector<32x96xf32>, vector<8x96xf32> -> vector<8x96xf32>
    %142 = vector.extract_strided_slice %141 {offsets = [0, 0], sizes = [8, 32], strides = [1, 1]} : vector<8x96xf32> to vector<8x32xf32>
    %143 = vector.shape_cast %142 : vector<8x32xf32> to vector<8x4x8xf32>
    %144 = tpu.transpose %143, [1, 0, 2] : vector<8x4x8xf32> -> vector<4x8x8xf32>
    %145 = vector.extract_strided_slice %141 {offsets = [0, 32], sizes = [8, 32], strides = [1, 1]} : vector<8x96xf32> to vector<8x32xf32>
    %146 = vector.shape_cast %145 : vector<8x32xf32> to vector<8x4x8xf32>
    %147 = tpu.transpose %146, [1, 0, 2] : vector<8x4x8xf32> -> vector<4x8x8xf32>
    %148 = vector.extract_strided_slice %141 {offsets = [0, 64], sizes = [8, 32], strides = [1, 1]} : vector<8x96xf32> to vector<8x32xf32>
    %149 = vector.shape_cast %148 : vector<8x32xf32> to vector<8x4x8xf32>
    %150 = tpu.transpose %149, [1, 0, 2] : vector<8x4x8xf32> -> vector<4x8x8xf32>
    "tpu.trace_start"() <{level = 10 : i32, message = "hqd,hkd->hqk"}> : () -> ()
    %cst_71 = arith.constant dense<0.000000e+00> : vector<4x8x8xf32>
    %151 = tpu.matmul %144, %147, %cst_71 {dimension_numbers = #tpu.dot_dimension_numbers<[2], [2], [1], [1], [0, 0, 0, 1, 1, 1], [0], [0]>} : vector<4x8x8xf32>, vector<4x8x8xf32>, vector<4x8x8xf32> -> vector<4x8x8xf32>
    "tpu.trace_stop"() : () -> ()
    %cst_72 = arith.constant dense<0xFF800000> : vector<4x8xf32>
    %152 = vector.multi_reduction <maximumf>, %151, %cst_72 [2] : vector<4x8x8xf32> to vector<4x8xf32>
    %153 = vector.shape_cast %152 : vector<4x8xf32> to vector<4x8x1xf32>
    %154 = vector.broadcast %153 : vector<4x8x1xf32> to vector<4x8x8xf32>
    %155 = arith.subf %151, %154 : vector<4x8x8xf32>
    %156 = math.exp %155 : vector<4x8x8xf32>
    %cst_73 = arith.constant dense<0.000000e+00> : vector<4x8xf32>
    %157 = vector.multi_reduction <add>, %156, %cst_73 [2] : vector<4x8x8xf32> to vector<4x8xf32>
    %158 = vector.shape_cast %157 : vector<4x8xf32> to vector<4x8x1xf32>
    %159 = tpu.reciprocal %158 {approx = true} : vector<4x8x1xf32> -> vector<4x8x1xf32>
    %160 = vector.broadcast %159 : vector<4x8x1xf32> to vector<4x8x8xf32>
    %161 = arith.mulf %156, %160 : vector<4x8x8xf32>
    "tpu.trace_start"() <{level = 10 : i32, message = "hqk,hkd->hqd"}> : () -> ()
    %cst_74 = arith.constant dense<0.000000e+00> : vector<4x8x8xf32>
    %162 = tpu.matmul %161, %150, %cst_74 {dimension_numbers = #tpu.dot_dimension_numbers<[2], [1], [1], [2], [0, 0, 0, 1, 1, 2], [0], [0]>} : vector<4x8x8xf32>, vector<4x8x8xf32>, vector<4x8x8xf32> -> vector<4x8x8xf32>
    "tpu.trace_stop"() : () -> ()
    %163 = tpu.transpose %162, [1, 0, 2] : vector<4x8x8xf32> -> vector<8x4x8xf32>
    %164 = vector.shape_cast %163 : vector<8x4x8xf32> to vector<8x32xf32>
    %c1_75 = arith.constant 1 : index
    %c0_76 = arith.constant 0 : index
    %c0_77 = arith.constant 0 : index
    %165 = vector.load %arg6[%c1_75, %c0_76, %c0_77] : memref<2x32x32xf32, #tpu.memory_space<vmem>>, vector<1x32x32xf32>
    %166 = vector.shape_cast %165 : vector<1x32x32xf32> to vector<32x32xf32>
    %cst_78 = arith.constant dense<0.000000e+00> : vector<8x32xf32>
    %167 = tpu.matmul %164, %166, %cst_78 {dimension_numbers = #tpu.dot_dimension_numbers<[1], [0], [0], [1], [0, 0, 1, 1], [], []>} : vector<8x32xf32>, vector<32x32xf32>, vector<8x32xf32> -> vector<8x32xf32>
    %c1_79 = arith.constant 1 : index
    %c0_80 = arith.constant 0 : index
    %c0_81 = arith.constant 0 : index
    %168 = vector.load %arg7[%c1_79, %c0_80, %c0_81] : memref<2x1x32xf32, #tpu.memory_space<vmem>>, vector<1x1x32xf32>
    %169 = vector.shape_cast %168 : vector<1x1x32xf32> to vector<1x32xf32>
    %170 = vector.broadcast %169 : vector<1x32xf32> to vector<8x32xf32>
    %171 = arith.addf %167, %170 : vector<8x32xf32>
    %172 = arith.addf %112, %171 : vector<8x32xf32>
    %c1_82 = arith.constant 1 : index
    %c0_83 = arith.constant 0 : index
    %c0_84 = arith.constant 0 : index
    %173 = vector.load %arg8[%c1_82, %c0_83, %c0_84] : memref<2x1x32xf32, #tpu.memory_space<vmem>>, vector<1x1x32xf32>
    %174 = vector.shape_cast %173 : vector<1x1x32xf32> to vector<1x32xf32>
    %c1_85 = arith.constant 1 : index
    %c0_86 = arith.constant 0 : index
    %c0_87 = arith.constant 0 : index
    %175 = vector.load %arg9[%c1_85, %c0_86, %c0_87] : memref<2x1x32xf32, #tpu.memory_space<vmem>>, vector<1x1x32xf32>
    %176 = vector.shape_cast %175 : vector<1x1x32xf32> to vector<1x32xf32>
    %cst_88 = arith.constant dense<0.000000e+00> : vector<8xf32>
    %177 = vector.multi_reduction <add>, %172, %cst_88 [1] : vector<8x32xf32> to vector<8xf32>
    %178 = vector.shape_cast %177 : vector<8xf32> to vector<8x1xf32>
    %cst_89 = arith.constant 3.200000e+01 : f32
    %179 = vector.broadcast %cst_89 : f32 to vector<8x1xf32>
    %180 = arith.divf %178, %179 : vector<8x1xf32>
    %181 = vector.broadcast %180 : vector<8x1xf32> to vector<8x32xf32>
    %182 = arith.subf %172, %181 : vector<8x32xf32>
    %183 = arith.mulf %182, %182 : vector<8x32xf32>
    %cst_90 = arith.constant dense<0.000000e+00> : vector<8xf32>
    %184 = vector.multi_reduction <add>, %183, %cst_90 [1] : vector<8x32xf32> to vector<8xf32>
    %185 = vector.shape_cast %184 : vector<8xf32> to vector<8x1xf32>
    %cst_91 = arith.constant 3.200000e+01 : f32
    %186 = vector.broadcast %cst_91 : f32 to vector<8x1xf32>
    %187 = arith.divf %185, %186 : vector<8x1xf32>
    %188 = vector.broadcast %180 : vector<8x1xf32> to vector<8x32xf32>
    %189 = arith.subf %172, %188 : vector<8x32xf32>
    %cst_92 = arith.constant 9.99999974E-6 : f32
    %190 = vector.broadcast %cst_92 : f32 to vector<8x1xf32>
    %191 = arith.addf %187, %190 : vector<8x1xf32>
    %192 = math.rsqrt %191 : vector<8x1xf32>
    %193 = vector.broadcast %192 : vector<8x1xf32> to vector<8x32xf32>
    %194 = arith.mulf %189, %193 : vector<8x32xf32>
    %195 = vector.broadcast %174 : vector<1x32xf32> to vector<8x32xf32>
    %196 = arith.mulf %194, %195 : vector<8x32xf32>
    %197 = vector.broadcast %176 : vector<1x32xf32> to vector<8x32xf32>
    %198 = arith.addf %196, %197 : vector<8x32xf32>
    %c1_93 = arith.constant 1 : index
    %c0_94 = arith.constant 0 : index
    %c0_95 = arith.constant 0 : index
    %199 = vector.load %arg10[%c1_93, %c0_94, %c0_95] : memref<2x32x64xf32, #tpu.memory_space<vmem>>, vector<1x32x64xf32>
    %200 = vector.shape_cast %199 : vector<1x32x64xf32> to vector<32x64xf32>
    %cst_96 = arith.constant dense<0.000000e+00> : vector<8x64xf32>
    %201 = tpu.matmul %198, %200, %cst_96 {dimension_numbers = #tpu.dot_dimension_numbers<[1], [0], [0], [1], [0, 0, 1, 1], [], []>} : vector<8x32xf32>, vector<32x64xf32>, vector<8x64xf32> -> vector<8x64xf32>
    %c1_97 = arith.constant 1 : index
    %c0_98 = arith.constant 0 : index
    %c0_99 = arith.constant 0 : index
    %202 = vector.load %arg11[%c1_97, %c0_98, %c0_99] : memref<2x1x64xf32, #tpu.memory_space<vmem>>, vector<1x1x64xf32>
    %203 = vector.shape_cast %202 : vector<1x1x64xf32> to vector<1x64xf32>
    %204 = vector.broadcast %203 : vector<1x64xf32> to vector<8x64xf32>
    %205 = arith.addf %201, %204 : vector<8x64xf32>
    %cst_100 = arith.constant 5.000000e-01 : f32
    %206 = vector.broadcast %cst_100 : f32 to vector<8x64xf32>
    %207 = arith.mulf %206, %205 : vector<8x64xf32>
    %cst_101 = arith.constant 0.707106769 : f32
    %208 = vector.broadcast %cst_101 : f32 to vector<8x64xf32>
    %209 = arith.mulf %205, %208 : vector<8x64xf32>
    %210 = math.erf %209 : vector<8x64xf32>
    %cst_102 = arith.constant 1.000000e+00 : f32
    %211 = vector.broadcast %cst_102 : f32 to vector<8x64xf32>
    %212 = arith.addf %211, %210 : vector<8x64xf32>
    %213 = arith.mulf %207, %212 : vector<8x64xf32>
    %c1_103 = arith.constant 1 : index
    %c0_104 = arith.constant 0 : index
    %c0_105 = arith.constant 0 : index
    %214 = vector.load %arg12[%c1_103, %c0_104, %c0_105] : memref<2x64x32xf32, #tpu.memory_space<vmem>>, vector<1x64x32xf32>
    %215 = vector.shape_cast %214 : vector<1x64x32xf32> to vector<64x32xf32>
    %cst_106 = arith.constant dense<0.000000e+00> : vector<8x32xf32>
    %216 = tpu.matmul %213, %215, %cst_106 {dimension_numbers = #tpu.dot_dimension_numbers<[1], [0], [0], [1], [0, 0, 1, 1], [], []>} : vector<8x64xf32>, vector<64x32xf32>, vector<8x32xf32> -> vector<8x32xf32>
    %c1_107 = arith.constant 1 : index
    %c0_108 = arith.constant 0 : index
    %c0_109 = arith.constant 0 : index
    %217 = vector.load %arg13[%c1_107, %c0_108, %c0_109] : memref<2x1x32xf32, #tpu.memory_space<vmem>>, vector<1x1x32xf32>
    %218 = vector.shape_cast %217 : vector<1x1x32xf32> to vector<1x32xf32>
    %219 = vector.broadcast %218 : vector<1x32xf32> to vector<8x32xf32>
    %220 = arith.addf %216, %219 : vector<8x32xf32>
    %221 = arith.addf %198, %220 : vector<8x32xf32>
    %c0_110 = arith.constant 0 : index
    %c0_111 = arith.constant 0 : index
    %222 = vector.load %arg14[%c0_110, %c0_111] : memref<1x32xf32, #tpu.memory_space<vmem>>, vector<1x32xf32>
    %c0_112 = arith.constant 0 : index
    %c0_113 = arith.constant 0 : index
    %223 = vector.load %arg15[%c0_112, %c0_113] : memref<1x32xf32, #tpu.memory_space<vmem>>, vector<1x32xf32>
    %cst_114 = arith.constant dense<0.000000e+00> : vector<8xf32>
    %224 = vector.multi_reduction <add>, %221, %cst_114 [1] : vector<8x32xf32> to vector<8xf32>
    %225 = vector.shape_cast %224 : vector<8xf32> to vector<8x1xf32>
    %cst_115 = arith.constant 3.200000e+01 : f32
    %226 = vector.broadcast %cst_115 : f32 to vector<8x1xf32>
    %227 = arith.divf %225, %226 : vector<8x1xf32>
    %228 = vector.broadcast %227 : vector<8x1xf32> to vector<8x32xf32>
    %229 = arith.subf %221, %228 : vector<8x32xf32>
    %230 = arith.mulf %229, %229 : vector<8x32xf32>
    %cst_116 = arith.constant dense<0.000000e+00> : vector<8xf32>
    %231 = vector.multi_reduction <add>, %230, %cst_116 [1] : vector<8x32xf32> to vector<8xf32>
    %232 = vector.shape_cast %231 : vector<8xf32> to vector<8x1xf32>
    %cst_117 = arith.constant 3.200000e+01 : f32
    %233 = vector.broadcast %cst_117 : f32 to vector<8x1xf32>
    %234 = arith.divf %232, %233 : vector<8x1xf32>
    %235 = vector.broadcast %227 : vector<8x1xf32> to vector<8x32xf32>
    %236 = arith.subf %221, %235 : vector<8x32xf32>
    %cst_118 = arith.constant 9.99999974E-6 : f32
    %237 = vector.broadcast %cst_118 : f32 to vector<8x1xf32>
    %238 = arith.addf %234, %237 : vector<8x1xf32>
    %239 = math.rsqrt %238 : vector<8x1xf32>
    %240 = vector.broadcast %239 : vector<8x1xf32> to vector<8x32xf32>
    %241 = arith.mulf %236, %240 : vector<8x32xf32>
    %242 = vector.broadcast %222 : vector<1x32xf32> to vector<8x32xf32>
    %243 = arith.mulf %241, %242 : vector<8x32xf32>
    %244 = vector.broadcast %223 : vector<1x32xf32> to vector<8x32xf32>
    %245 = arith.addf %243, %244 : vector<8x32xf32>
    %c0_119 = arith.constant 0 : index
    %c0_120 = arith.constant 0 : index
    %246 = vector.load %arg16[%c0_119, %c0_120] : memref<32x1xf32, #tpu.memory_space<vmem>>, vector<32x1xf32>
    %cst_121 = arith.constant dense<0.000000e+00> : vector<8x1xf32>
    %247 = tpu.matmul %245, %246, %cst_121 {dimension_numbers = #tpu.dot_dimension_numbers<[1], [0], [0], [1], [0, 0, 1, 1], [], []>} : vector<8x32xf32>, vector<32x1xf32>, vector<8x1xf32> -> vector<8x1xf32>
    %c0_122 = arith.constant 0 : index
    %c0_123 = arith.constant 0 : index
    %248 = vector.load %arg17[%c0_122, %c0_123] : memref<1x1xf32, #tpu.memory_space<vmem>>, vector<1x1xf32>
    %249 = vector.broadcast %248 : vector<1x1xf32> to vector<8x1xf32>
    %250 = arith.addf %247, %249 : vector<8x1xf32>
    %cst_124 = arith.constant dense<0xFF800000> : vector<1xf32>
    %251 = vector.multi_reduction <maximumf>, %250, %cst_124 [0] : vector<8x1xf32> to vector<1xf32>
    %252 = vector.shape_cast %251 : vector<1xf32> to vector<1x1xf32>
    %253 = vector.broadcast %252 : vector<1x1xf32> to vector<8x1xf32>
    %254 = arith.subf %250, %253 : vector<8x1xf32>
    %255 = math.exp %254 : vector<8x1xf32>
    %256 = vector.broadcast %255 : vector<8x1xf32> to vector<8x32xf32>
    %257 = arith.mulf %256, %245 : vector<8x32xf32>
    %cst_125 = arith.constant dense<0.000000e+00> : vector<32xf32>
    %258 = vector.multi_reduction <add>, %257, %cst_125 [0] : vector<8x32xf32> to vector<32xf32>
    %259 = vector.shape_cast %258 : vector<32xf32> to vector<1x32xf32>
    %cst_126 = arith.constant dense<0.000000e+00> : vector<1xf32>
    %260 = vector.multi_reduction <add>, %255, %cst_126 [0] : vector<8x1xf32> to vector<1xf32>
    %261 = vector.shape_cast %260 : vector<1xf32> to vector<1x1xf32>
    %262 = tpu.reciprocal %261 {approx = true} : vector<1x1xf32> -> vector<1x1xf32>
    %263 = vector.broadcast %262 : vector<1x1xf32> to vector<1x32xf32>
    %264 = arith.mulf %259, %263 : vector<1x32xf32>
    %c0_127 = arith.constant 0 : index
    %c0_128 = arith.constant 0 : index
    %265 = vector.load %arg18[%c0_127, %c0_128] : memref<32x10xf32, #tpu.memory_space<vmem>>, vector<32x10xf32>
    %cst_129 = arith.constant dense<0.000000e+00> : vector<1x10xf32>
    %266 = tpu.matmul %264, %265, %cst_129 {dimension_numbers = #tpu.dot_dimension_numbers<[1], [0], [0], [1], [0, 0, 1, 1], [], []>} : vector<1x32xf32>, vector<32x10xf32>, vector<1x10xf32> -> vector<1x10xf32>
    %c0_130 = arith.constant 0 : index
    %c0_131 = arith.constant 0 : index
    %267 = vector.load %arg19[%c0_130, %c0_131] : memref<1x10xf32, #tpu.memory_space<vmem>>, vector<1x10xf32>
    %268 = arith.addf %266, %267 : vector<1x10xf32>
    %c0_132 = arith.constant 0 : index
    %c0_133 = arith.constant 0 : index
    %c0_134 = arith.constant 0 : index
    %269 = vector.load %arg20[%c0_132, %c0_133, %c0_134] : memref<1x1x10xf32, #tpu.memory_space<vmem>>, vector<1x1x10xf32>
    %270 = vector.shape_cast %269 : vector<1x1x10xf32> to vector<1x10xf32>
    %271 = vector.shape_cast %268 : vector<1x10xf32> to vector<1x1x10xf32>
    tpu.vector_store %arg20[%c0_132, %c0_133, %c0_134], %271 {strides = array<i32>} : memref<1x1x10xf32, #tpu.memory_space<vmem>>, vector<1x1x10xf32>,
    return
  }
  func.func @transform_0(%arg0: i32) -> (i32, i32, i32) {
    %c0_i32 = arith.constant 0 : i32
    %c0_i32_0 = arith.constant 0 : i32
    %c0_i32_1 = arith.constant 0 : i32
    return %arg0, %c0_i32, %c0_i32_0 : i32, i32, i32
  }
  func.func @transform_1(%arg0: i32) -> (i32, i32) {
    %c0_i32 = arith.constant 0 : i32
    %c0_i32_0 = arith.constant 0 : i32
    %c0_i32_1 = arith.constant 0 : i32
    return %c0_i32, %c0_i32_0 : i32, i32
  }
  func.func @transform_2(%arg0: i32) -> (i32, i32, i32) {
    %c0_i32 = arith.constant 0 : i32
    %c0_i32_0 = arith.constant 0 : i32
    %c0_i32_1 = arith.constant 0 : i32
    %c0_i32_2 = arith.constant 0 : i32
    return %c0_i32, %c0_i32_0, %c0_i32_1 : i32, i32, i32
  }
  func.func @transform_3(%arg0: i32) -> (i32, i32, i32) {
    %c0_i32 = arith.constant 0 : i32
    %c0_i32_0 = arith.constant 0 : i32
    %c0_i32_1 = arith.constant 0 : i32
    %c0_i32_2 = arith.constant 0 : i32
    return %c0_i32, %c0_i32_0, %c0_i32_1 : i32, i32, i32
  }
  func.func @transform_4(%arg0: i32) -> (i32, i32, i32) {
    %c0_i32 = arith.constant 0 : i32
    %c0_i32_0 = arith.constant 0 : i32
    %c0_i32_1 = arith.constant 0 : i32
    %c0_i32_2 = arith.constant 0 : i32
    return %c0_i32, %c0_i32_0, %c0_i32_1 : i32, i32, i32
  }
  func.func @transform_5(%arg0: i32) -> (i32, i32, i32) {
    %c0_i32 = arith.constant 0 : i32
    %c0_i32_0 = arith.constant 0 : i32
    %c0_i32_1 = arith.constant 0 : i32
    %c0_i32_2 = arith.constant 0 : i32
    return %c0_i32, %c0_i32_0, %c0_i32_1 : i32, i32, i32
  }
  func.func @transform_6(%arg0: i32) -> (i32, i32, i32) {
    %c0_i32 = arith.constant 0 : i32
    %c0_i32_0 = arith.constant 0 : i32
    %c0_i32_1 = arith.constant 0 : i32
    %c0_i32_2 = arith.constant 0 : i32
    return %c0_i32, %c0_i32_0, %c0_i32_1 : i32, i32, i32
  }
  func.func @transform_7(%arg0: i32) -> (i32, i32, i32) {
    %c0_i32 = arith.constant 0 : i32
    %c0_i32_0 = arith.constant 0 : i32
    %c0_i32_1 = arith.constant 0 : i32
    %c0_i32_2 = arith.constant 0 : i32
    return %c0_i32, %c0_i32_0, %c0_i32_1 : i32, i32, i32
  }
  func.func @transform_8(%arg0: i32) -> (i32, i32, i32) {
    %c0_i32 = arith.constant 0 : i32
    %c0_i32_0 = arith.constant 0 : i32
    %c0_i32_1 = arith.constant 0 : i32
    %c0_i32_2 = arith.constant 0 : i32
    return %c0_i32, %c0_i32_0, %c0_i32_1 : i32, i32, i32
  }
  func.func @transform_9(%arg0: i32) -> (i32, i32, i32) {
    %c0_i32 = arith.constant 0 : i32
    %c0_i32_0 = arith.constant 0 : i32
    %c0_i32_1 = arith.constant 0 : i32
    %c0_i32_2 = arith.constant 0 : i32
    return %c0_i32, %c0_i32_0, %c0_i32_1 : i32, i32, i32
  }
  func.func @transform_10(%arg0: i32) -> (i32, i32, i32) {
    %c0_i32 = arith.constant 0 : i32
    %c0_i32_0 = arith.constant 0 : i32
    %c0_i32_1 = arith.constant 0 : i32
    %c0_i32_2 = arith.constant 0 : i32
    return %c0_i32, %c0_i32_0, %c0_i32_1 : i32, i32, i32
  }
  func.func @transform_11(%arg0: i32) -> (i32, i32, i32) {
    %c0_i32 = arith.constant 0 : i32
    %c0_i32_0 = arith.constant 0 : i32
    %c0_i32_1 = arith.constant 0 : i32
    %c0_i32_2 = arith.constant 0 : i32
    return %c0_i32, %c0_i32_0, %c0_i32_1 : i32, i32, i32
  }
  func.func @transform_12(%arg0: i32) -> (i32, i32, i32) {
    %c0_i32 = arith.constant 0 : i32
    %c0_i32_0 = arith.constant 0 : i32
    %c0_i32_1 = arith.constant 0 : i32
    %c0_i32_2 = arith.constant 0 : i32
    return %c0_i32, %c0_i32_0, %c0_i32_1 : i32, i32, i32
  }
  func.func @transform_13(%arg0: i32) -> (i32, i32) {
    %c0_i32 = arith.constant 0 : i32
    %c0_i32_0 = arith.constant 0 : i32
    %c0_i32_1 = arith.constant 0 : i32
    return %c0_i32, %c0_i32_0 : i32, i32
  }
  func.func @transform_14(%arg0: i32) -> (i32, i32) {
    %c0_i32 = arith.constant 0 : i32
    %c0_i32_0 = arith.constant 0 : i32
    %c0_i32_1 = arith.constant 0 : i32
    return %c0_i32, %c0_i32_0 : i32, i32
  }
  func.func @transform_15(%arg0: i32) -> (i32, i32) {
    %c0_i32 = arith.constant 0 : i32
    %c0_i32_0 = arith.constant 0 : i32
    %c0_i32_1 = arith.constant 0 : i32
    return %c0_i32, %c0_i32_0 : i32, i32
  }
  func.func @transform_16(%arg0: i32) -> (i32, i32) {
    %c0_i32 = arith.constant 0 : i32
    %c0_i32_0 = arith.constant 0 : i32
    %c0_i32_1 = arith.constant 0 : i32
    return %c0_i32, %c0_i32_0 : i32, i32
  }
  func.func @transform_17(%arg0: i32) -> (i32, i32) {
    %c0_i32 = arith.constant 0 : i32
    %c0_i32_0 = arith.constant 0 : i32
    %c0_i32_1 = arith.constant 0 : i32
    return %c0_i32, %c0_i32_0 : i32, i32
  }
  func.func @transform_18(%arg0: i32) -> (i32, i32) {
    %c0_i32 = arith.constant 0 : i32
    %c0_i32_0 = arith.constant 0 : i32
    %c0_i32_1 = arith.constant 0 : i32
    return %c0_i32, %c0_i32_0 : i32, i32
  }
  func.func @transform_19(%arg0: i32) -> (i32, i32, i32) {
    %c0_i32 = arith.constant 0 : i32
    %c0_i32_0 = arith.constant 0 : i32
    %c0_i32_1 = arith.constant 0 : i32
    return %arg0, %c0_i32, %c0_i32_0 : i32, i32, i32
  }
}

</mosaic_0001>

<bundles_post_ra>
// kernel: tpu_custom_call.1
= control target key start
LH: loop header
LB: loop body
LE: loop exit
PB: predicated region body
PF: predicated region fallthrough
CT: control target
= control target key end

     0   :  { %s5642_s0 = inlined_call_operand.vmem [shape: f32[2,8,32], index: 0, kind: input, shape index: {}]   ;;  %s5643_s1 = inlined_call_operand.vmem [shape: f32[8,32], index: 1, kind: input, shape index: {}]   ;;  %s5644_s2 = inlined_call_operand.vmem [shape: f32[2,1,32], index: 2, kind: input, shape index: {}]   ;;  %s5645_s3 = inlined_call_operand.vmem [shape: f32[2,1,32], index: 3, kind: input, shape index: {}]   ;;  %s5646_s4 = inlined_call_operand.vmem [shape: f32[2,32,96], index: 4, kind: input, shape index: {}]   ;;  %s5647_s5 = inlined_call_operand.vmem [shape: f32[2,32,32], index: 5, kind: input, shape index: {}]   ;;  %s5648_s6 = inlined_call_operand.vmem [shape: f32[2,1,32], index: 6, kind: input, shape index: {}]   ;;  %s5649_s7 = inlined_call_operand.vmem [shape: f32[2,1,32], index: 7, kind: input, shape index: {}]   ;;  %s5650_s8 = inlined_call_operand.vmem [shape: f32[2,1,32], index: 8, kind: input, shape index: {}]   ;;  %s5651_s9 = inlined_call_operand.vmem [shape: f32[2,32,64], index: 9, kind: input, shape index: {}]   ;;  %s5652_s10 = inlined_call_operand.vmem [shape: f32[2,1,64], index: 10, kind: input, shape index: {}]   ;;  %s5653_s11 = inlined_call_operand.vmem [shape: f32[2,64,32], index: 11, kind: input, shape index: {}]   ;;  %s5654_s12 = inlined_call_operand.vmem [shape: f32[2,1,32], index: 12, kind: input, shape index: {}]   ;;  %s5655_s13 = inlined_call_operand.vmem [shape: f32[1,32], index: 13, kind: input, shape index: {}]   ;;  %s5656_s14 = inlined_call_operand.vmem [shape: f32[1,32], index: 14, kind: input, shape index: {}]   ;;  %s5657_s15 = inlined_call_operand.vmem [shape: f32[32,1], index: 15, kind: input, shape index: {}]   ;;  %s5658_s16 = inlined_call_operand.<no memory space> [shape: f32[1,1], index: 16, kind: input, shape index: {}]   ;;  %s5659_s17 = inlined_call_operand.vmem [shape: f32[32,10], index: 17, kind: input, shape index: {}]   ;;  %s5660_s18 = inlined_call_operand.vmem [shape: f32[1,10], index: 18, kind: input, shape index: {}]   ;;  %s5661_s19 = inlined_call_operand.hbm [shape: f32[2,1,10], index: 19, kind: output, shape index: {}]  }
   0x1   :  { %5678 = sst [smem:[#allocation9_spill]] %s5642_s0  ;;  %v24_v0 = vstv %s5658_s16 }
   0x2   :  { %5679 = sst [smem:[#allocation10_spill]] %s5643_s1  ;;  %25 = vst [vmem:[#allocation2] sm:$0x1] %v24_v0 }
   0x3   :  { %5680 = sst [smem:[#allocation11_spill]] %s5644_s2 }
   0x4   :  { %5681 = sst [smem:[#allocation12_spill]] %s5645_s3 }
   0x5   :  { %5682 = sst [smem:[#allocation13_spill]] %s5646_s4 }
   0x6   :  { %5683 = sst [smem:[#allocation14_spill]] %s5647_s5 }
   0x7   :  { %26 = vsyncpa [#allocation4], 0 }
   0x8   :  { %28 = vsyncpa [#allocation4 + $0x1], 0  ;;  %s4937_s20 = smov 0   ;;  %s4939_s21 = smov 0  }
   0x9   :  { %s4941_s1 = smov 0   ;;  %s4943_s22 = smov 0  }
   0xa LB: > { %5684 = sst [smem:[#allocation6_spill]] %s4813_s1  ;;  %s4958_s16 = sadd.s32 4294967295, %s4817_s22   ;;  %s4817_s22 = sphi %s4943_s22, %s5703_s22   ;;  %s4813_s1 = sphi %s4941_s1, %s5705_s1   ;;  %s4809_s21 = sphi %s4939_s21, %s5707_s21   ;;  %s4805_s20 = sphi %s4937_s20, %s5706_s20  }
   0xb   : > { %s4180_s2 = sadd.s32 4294967294, %s4817_s22   ;;  %s4962_s23 = sadd.s32 1, %s4817_s22  }
   0xc   : > { %5685 = sst [smem:[#allocation7_spill]] %s4962_s23  ;;  %s445_s24 = sadd.s32 1, %s4813_s1 }
   0xd   : > { %s442_s25 = ssub.s32 %s4817_s22, %s4962_s23  ;;  %p455_p0 = scmp.ne.s32.totalorder %s4813_s1, %s4809_s21 }
   0xe   : > { %p443_p1 = scmp.eq.s32.totalorder %s442_s25, 0  ;;  %p456_p2 = scmp.eq.s32.totalorder %s4958_s16, 1 }
   0xf   : > { %p461_p3 = scmp.ne.s32.totalorder %s4809_s21, %s4805_s20  ;;  %p462_p4 = scmp.eq.s32.totalorder %s4180_s2, 1 }
  0x10   : > { %s4973_s3 = scalar_select %p443_p1, %s4813_s1, %s445_s24  }
  0x11   : > { %p4975_p5 = por %p456_p2, %p455_p0  ;;  %p4979_p6 = por %p462_p4, %p461_p3 }
  0x12   : > { %5686 = sst [smem:[#allocation8_spill]] %s4973_s3  ;;  %p4183_p7 = scmp.ge.s32.totalorder %s4817_s22, 1 }
  0x13   : > { %p541_p8 = scmp.lt.s32.totalorder %s4817_s22, 3 }
  0x15   : > { %p542_p9 = pnand %p4183_p7, %p541_p8 }
  0x16   : > { %p595_p10 = scmp.lt.s32.totalorder (!%p542_p9), %s4958_s16, 1  ;;  %s5689_s2 = sld [smem:[#allocation10_spill]] (!%p542_p9)  ;;  %vm604_vm0 = vcmask (!%p542_p9), 261120   ;;  %v4819_v13 = vmov (!%p542_p9), 0.0|0.0   ;;  %vm4820_vm1 = vmmov (!%p542_p9), 0   ;;  %v4821_v16 = vmov (!%p542_p9), 0.0  }
  0x17   : > { %545 = sbr.rel (%p542_p9) target bundleno = 6288 (0x1890), region = 96  ;;  %s5690_s3 = sld [smem:[#allocation9_spill]] (!%p542_p9)  ;;  %4578 = vmatprep.subr.bf16.mxu0 (!%p542_p9), %v4819_v13  ;;  %4380 = vmatprep.mubr.msk.f32.mxu0 (!%p542_p9), %vm4820_vm1, %v4821_v16  ;;  %v4826_v32 = vmov (!%p542_p9), 1983009808   ;;  %v725_v34 = vlaneseq (!%p542_p9)  ;;  %v4827_v37 = vmov (!%p542_p9), 1934713408  }
  0x18   : > { %s5691_s4 = sld [smem:[#allocation13_spill]] (!%p542_p9)  ;;  %4383 = vmatprep.subr.mxu1 (!%p542_p9), %v4821_v16  ;;  %4385 = vmatprep.mubr.msk.f32.mxu1 (!%p542_p9), %vm4820_vm1, %v4821_v16  ;;  %s5692_s0 = sld [smem:[#allocation11_spill]] (!%p542_p9)  ;;  %v723_v33 = vunpack.c.l.s4 (!%p542_p9), %v4826_v32  ;;  %v755_v38 = vunpack.c.l.s4 (!%p542_p9), %v4827_v37  ;;  %vm1152_vm2 = vcmask (!%p542_p9), 64512   ;;  %vm1942_vm3 = vcmask (!%p542_p9), 130048  }
  0x19   : > { %s5672_s30 = smov (!%p542_p9), 104   ;;  %s5674_s24 = smov (!%p542_p9), 112   ;;  %v726_v36 = vshrl.u32 (!%p542_p9), %v725_v34, 7  ;;  %vm1944_vm4 = vcmask (!%p542_p9), 195584   ;;  %vm2164_vm5 = vcmask (!%p542_p9), 523264   ;;  %vm3994_vm6 = vcmask (!%p542_p9), 7168  }
  0x1a   : > { %s5667_s25 = smov (!%p542_p9), 96   ;;  %v724_v35 = vunpack.c.0.s8 (!%p542_p9), %v723_v33  ;;  %v756_v45 = vunpack.c.0.s8 (!%p542_p9), %v755_v38  ;;  %s5694_s5 = sld [smem:[#allocation14_spill]] (!%p542_p9)  ;;  %vm4110_vm7 = vcmask (!%p542_p9), 73728  }
  0x1b   : > { %s5695_s23 = smov (!%p542_p9), 112  }
  0x1c   : > { %v600_v1 = vld [vmem:[%s5689_s2] sm:$0xff] (!%p542_p9)  ;;  %s5673_s2 = smov (!%p542_p9), 120   ;;  %v5054_v42 = vsub.s32 (!%p542_p9), %v724_v35, %v726_v36  ;;  %v5064_v51 = vsub.s32 (!%p542_p9), %v756_v45, %v726_v36 }
  0x1e   : > { %s596_s28 = scalar_select %p595_p10, %s4958_s16, 1  ;;  %v633_v10 = vld [vmem:[%s5691_s4] sm:$0xff]  ;;  %v634_v11 = vld [vmem:[%s5691_s4 + $0x8] sm:$0xff]  ;;  %v635_v12 = vld [vmem:[%s5691_s4 + $0x10] sm:$0xff] }
  0x1f   : > { %v4579_v14 = vpack.c.bf16 %v634_v11, %v633_v10  ;;  %v636_v15 = vld [vmem:[%s5691_s4 + $0x18] sm:$0xff]  ;;  %v4185_v22 = vld [vmem:[%s5692_s0] ss:$0 sm:$0xff] }
  0x20   : > { %s4184_s29 = sshll.u32 %s596_s28, 3  ;;  %v4582_v17 = vpack.c.bf16 %v636_v15, %v635_v12  ;;  %s5665_s28 = smov 64  }
  0x21   : > { %s598_s1 = scalar_lea.vmem %s5690_s3, %s4184_s29  ;;  %4580 = vmatpush3.bf16.msra.mxu0 %v4579_v14  ;;  %s5693_s29 = sld [smem:[#allocation12_spill]] }
  0x22   : > { %v599_v2 = vld [vmem:[%s598_s1] sm:$0xff]  ;;  %4581 = vmatprep.subr.bf16.mxu0 %v4819_v13  ;;  %s5670_s1 = smov 24   ;;  %s5698_s3 = smov 96  }
  0x23   : > { %v4993_v3 = vadd.f32 %v600_v1, %v599_v2 }
  0x25   : > { %v605_v4 = vsel %vm604_vm0, %v4993_v3, 0.0  ;;  %4583 = vmatpush3.bf16.msra.mxu0 %v4582_v17 }
  0x26   : > { %606 = vadd.xlane.f32.xlu0 %v605_v4  ;;  %4393 = vmatprep.subr.mxu0 %v4821_v16 }
  0x27   : > { %v4186_v24 = vld [vmem:[%s5693_s29] ss:$0 sm:$0xff] }
  0xb3   : > { %v607_v5 = vpop.xlane.xlu0 %606 }
  0xb4   : > { %v609_v6 = vmul.f32 0.03125, %v607_v5 }
  0xb6   : > { %v610_v7 = vsub.f32 %v4993_v3, %v609_v6 }
  0xb8   : > { %v611_v8 = vmul.f32 %v610_v7, %v610_v7 }
  0xba   : > { %v612_v9 = vsel %vm604_vm0, %v611_v8, 0.0 }
  0xbb   : > { %613 = vadd.xlane.f32.xlu0 %v612_v9 }
 0x148   : > { %v614_v18 = vpop.xlane.xlu0 %613 }
 0x149   : > { %v615_v19 = vmul.f32 0.03125, %v614_v18 }
 0x14b   : > { %v616_v20 = vadd.f32 1e-05, %v615_v19 }
 0x14d   : > { %4705 = vrsqrt.f32 %v616_v20 }
 0x157   : > { %v4706_v21 = vpop.eup %4705 }
 0x158   : > { %v618_v23 = vmul.f32 %v4706_v21, %v610_v7 }
 0x15a   : > { %v625_v25 = vmul.f32 %v4185_v22, %v618_v23 }
 0x15c   : > { %v632_v26 = vadd.f32 %v4186_v24, %v625_v25 }
 0x15e   : > { %4381 = vmatmul.mubr.msk.f32.vlgmr.msra.gmra.mrb[0].mxu0 %vm604_vm0, %v632_v26 }
 0x15f   : > { %4395 = vmatprep.mubr.msk.f32.mxu0 %vm4820_vm1, %v4821_v16 }
 0x231   : > { %v5028_v27 = vpop.f32.mrb[0].mxu0 }
 0x232   : > { %717 = vrot.lane.b32.xlu0 %v5028_v27, %s5672_s30  ;;  %711 = vrot.lane.b32.xlu1 %v5028_v27, %s5673_s2  ;;  %v4382_v28 = vpop.f32.mrb[1].mxu0  ;;  %s5701_s30 = smov 8   ;;  %s5702_s2 = smov 24  }
 0x236   : > { %714 = vrot.lane.b32.xlu1 %v5028_v27, %s5674_s24  ;;  %s5696_s24 = smov 120  }
 0x23a   : > { %856 = vrot.lane.b32.xlu1 %v5028_v27, %s5667_s25 }
 0x2a4   : > { %v5038_v29 = vpop.permute.xlu1 %711  ;;  %v5046_v31 = vpop.permute.xlu0 %717 }
 0x2a5   : > { %858 = vrot.lane.b32.xlu1 %v5038_v29, %s5667_s25  ;;  %v736_v43 = vcombine.low %v5038_v29, %v5046_v31  ;;  %v737_v44 = vcombine.high %v5038_v29, %v5046_v31 }
 0x2a7   : > { %v744_v49 = vrot.slane %v736_v43, %v5054_v42  ;;  %v751_v50 = vrot.slane %v737_v44, %v5054_v42 }
 0x2a8   : > { %v5042_v30 = vpop.permute.xlu1 %714 }
 0x2a9   : > { %860 = vrot.lane.b32.xlu1 %v5042_v30, %s5667_s25  ;;  %v720_v39 = vcombine.low %v5028_v27, %v5042_v30  ;;  %v721_v40 = vcombine.high %v5028_v27, %v5042_v30 }
 0x2ab   : > { %v728_v46 = vrot.slane %v720_v39, %v5054_v42  ;;  %v735_v47 = vrot.slane %v721_v40, %v5054_v42 }
 0x2ac   : > { %v857_v41 = vpop.permute.xlu1 %856 }
 0x2ad   : > { %862 = vrot.lane.b32.xlu1 %v5046_v31, %s5667_s25  ;;  %v752_v52 = vcombine.low %v728_v46, %v744_v49  ;;  %v753_v53 = vcombine.high %v728_v46, %v744_v49  ;;  %v768_v54 = vcombine.low %v735_v47, %v751_v50  ;;  %v769_v55 = vcombine.high %v735_v47, %v751_v50  ;;  %s5671_s25 = smov 16  }
 0x2af   : > { %v760_v59 = vrot.slane %v752_v52, %v5064_v51  ;;  %v767_v60 = vrot.slane %v753_v53, %v5064_v51  ;;  %v776_v61 = vrot.slane %v768_v54, %v5064_v51  ;;  %v783_v62 = vrot.slane %v769_v55, %v5064_v51 }
 0x2b1   : > { %v788_v7 = vcombine.low %v760_v59, %v767_v60  ;;  %v4188_v8 = vcombine.high %v760_v59, %v767_v60  ;;  %v804_v9 = vcombine.low %v776_v61, %v783_v62  ;;  %v4189_v10 = vcombine.high %v776_v61, %v783_v62 }
 0x2b3   : > { %v795_v21 = vrot.slane %v788_v7, %v5054_v42  ;;  %v803_v22 = vrot.slane %v4188_v8, %v5054_v42  ;;  %v811_v23 = vrot.slane %v804_v9, %v5054_v42  ;;  %v819_v24 = vrot.slane %v4189_v10, %v5054_v42 }
 0x2b5   : > { %v820_v37 = vcombine.low %v795_v21, %v803_v22  ;;  %v821_v38 = vcombine.high %v795_v21, %v803_v22  ;;  %v836_v39 = vcombine.low %v811_v23, %v819_v24  ;;  %v837_v40 = vcombine.high %v811_v23, %v819_v24 }
 0x2b7   : > { %v828_v50 = vrot.slane %v820_v37, %v5064_v51  ;;  %v844_v52 = vrot.slane %v836_v39, %v5064_v51  ;;  %v835_v53 = vrot.slane %v821_v38, %v5064_v51  ;;  %v851_v54 = vrot.slane %v837_v40, %v5064_v51 }
 0x2b9   : > { %v853_v60 = vcombine.high %v828_v50, %v844_v52  ;;  %v855_v62 = vcombine.high %v835_v53, %v851_v54 }
 0x317   : > { %v859_v48 = vpop.permute.xlu1 %858 }
 0x31b   : > { %v861_v56 = vpop.permute.xlu1 %860 }
 0x31c   : > { %v868_v57 = vcombine.low %v857_v41, %v861_v56  ;;  %v869_v58 = vcombine.high %v857_v41, %v861_v56 }
 0x31e   : > { %v876_v2 = vrot.slane %v868_v57, %v5054_v42  ;;  %v883_v4 = vrot.slane %v869_v58, %v5054_v42  ;;  %v852_v57 = vcombine.low %v828_v50, %v844_v52  ;;  %v854_v58 = vcombine.low %v835_v53, %v851_v54 }
 0x31f   : > { %v863_v63 = vpop.permute.xlu1 %862 }
 0x320   : > { %v884_v0 = vcombine.low %v859_v48, %v863_v63  ;;  %v885_v1 = vcombine.high %v859_v48, %v863_v63 }
 0x322   : > { %v892_v5 = vrot.slane %v884_v0, %v5054_v42  ;;  %v899_v6 = vrot.slane %v885_v1, %v5054_v42 }
 0x324   : > { %v900_v11 = vcombine.low %v876_v2, %v892_v5  ;;  %v901_v12 = vcombine.high %v876_v2, %v892_v5  ;;  %v916_v14 = vcombine.low %v883_v4, %v899_v6  ;;  %v917_v15 = vcombine.high %v883_v4, %v899_v6 }
 0x326   : > { %v908_v17 = vrot.slane %v900_v11, %v5064_v51  ;;  %v915_v18 = vrot.slane %v901_v12, %v5064_v51  ;;  %v924_v19 = vrot.slane %v916_v14, %v5064_v51  ;;  %v931_v20 = vrot.slane %v917_v15, %v5064_v51 }
 0x328   : > { %v936_v25 = vcombine.low %v908_v17, %v915_v18  ;;  %v4190_v26 = vcombine.high %v908_v17, %v915_v18  ;;  %v952_v28 = vcombine.low %v924_v19, %v931_v20  ;;  %v4191_v32 = vcombine.high %v924_v19, %v931_v20 }
 0x32a   : > { %v943_v33 = vrot.slane %v936_v25, %v5054_v42  ;;  %v951_v34 = vrot.slane %v4190_v26, %v5054_v42  ;;  %v959_v35 = vrot.slane %v952_v28, %v5054_v42  ;;  %v967_v36 = vrot.slane %v4191_v32, %v5054_v42 }
 0x32c   : > { %v968_v41 = vcombine.low %v943_v33, %v951_v34  ;;  %v969_v43 = vcombine.high %v943_v33, %v951_v34  ;;  %v984_v44 = vcombine.low %v959_v35, %v967_v36  ;;  %v985_v45 = vcombine.high %v959_v35, %v967_v36 }
 0x32e   : > { %v976_v46 = vrot.slane %v968_v41, %v5064_v51  ;;  %v992_v47 = vrot.slane %v984_v44, %v5064_v51  ;;  %v983_v48 = vrot.slane %v969_v43, %v5064_v51  ;;  %v999_v49 = vrot.slane %v985_v45, %v5064_v51 }
 0x330   : > { %v1000_v55 = vcombine.low %v976_v46, %v992_v47  ;;  %v1002_v56 = vcombine.low %v983_v48, %v999_v49  ;;  %v1001_v59 = vcombine.high %v976_v46, %v992_v47  ;;  %v1003_v61 = vcombine.high %v983_v48, %v999_v49 }
 0x332   : > { %4384 = vmatpush3.xpose.msk.msra.mxu1 %vm1152_vm2, %v1000_v55  ;;  %4394 = vmatpush3.xpose.msk.msra.mxu0 %vm1152_vm2, %v1002_v56 }
 0x333   : > { %4388 = vmatprep.subr.mxu1 %v4821_v16  ;;  %4403 = vmatprep.subr.mxu0 %v4821_v16 }
 0x335   : > { %4386 = vmatmul.mubr.msk.f32.vlgmr.msra.gmra.mrb[0].mxu1 %vm1152_vm2, %v852_v57  ;;  %4396 = vmatmul.mubr.msk.f32.vlgmr.msra.gmra.mrb[2].mxu0 %vm1152_vm2, %v854_v58 }
 0x336   : > { %4389 = vmatpush3.xpose.msk.msra.mxu1 %vm1152_vm2, %v1001_v59  ;;  %4390 = vmatprep.mubr.msk.f32.mxu1 %vm4820_vm1, %v4821_v16 }
 0x337   : > { %4398 = vmatprep.subr.mxu1 %v4821_v16  ;;  %4405 = vmatprep.mubr.msk.f32.mxu0 %vm4820_vm1, %v4821_v16 }
 0x339   : > { %4391 = vmatmul.mubr.msk.f32.vlgmr.msra.gmra.mrb[2].mxu1 %vm1152_vm2, %v853_v60 }
 0x33a   : > { %4399 = vmatpush3.xpose.msk.msra.mxu1 %vm1152_vm2, %v1003_v61  ;;  %4400 = vmatprep.mubr.msk.f32.mxu1 %vm4820_vm1, %v4821_v16 }
 0x33b   : > { %4408 = vmatprep.subr.mxu1 %v4821_v16 }
 0x33d   : > { %4401 = vmatmul.mubr.msk.f32.vlgmr.msra.gmra.mrb[4].mxu1 %vm1152_vm2, %v855_v62 }
 0x33e   : > { %4410 = vmatprep.mubr.msk.f32.mxu1 %vm4820_vm1, %v4821_v16 }
 0x408   : > { %v1225_v63 = vpop.f32.mrb[0].mxu1  ;;  %v1377_v0 = vpop.f32.mrb[2].mxu0 }
 0x409   : > { %v4387_v1 = vpop.f32.mrb[1].mxu1  ;;  %v4397_v2 = vpop.f32.mrb[3].mxu0  ;;  %v1457_v4 = vsel %vm1152_vm2, %v1225_v63, -inf  ;;  %v1463_v8 = vsel %vm1152_vm2, %v1377_v0, -inf }
 0x40a   : > { %1458 = vmax.xlane.f32.xlu1 %v1457_v4 }
 0x40c   : > { %v1301_v5 = vpop.f32.mrb[2].mxu1 }
 0x40d   : > { %v4392_v6 = vpop.f32.mrb[3].mxu1  ;;  %v1460_v7 = vsel %vm1152_vm2, %v1301_v5, -inf }
 0x40e   : > { %1461 = vmax.xlane.f32.xlu0 %v1460_v7  ;;  %1464 = vmax.xlane.f32.xlu1 %v1463_v8 }
 0x410   : > { %v1453_v9 = vpop.f32.mrb[4].mxu1 }
 0x411   : > { %v4402_v10 = vpop.f32.mrb[5].mxu1  ;;  %v1466_v11 = vsel %vm1152_vm2, %v1453_v9, -inf }
 0x412   : > { %1467 = vmax.xlane.f32.xlu0 %v1466_v11 }
 0x41f   : > { %1004 = vrot.lane.b32.xlu1 %v5028_v27, %s5665_s28 }
 0x497   : > { %v1459_v12 = vpop.xlane.xlu1 %1458 }
 0x498   : > { %v1469_v14 = vsub.f32 %v1225_v63, %v1459_v12 }
 0x49a   : > { %v1473_v15 = vmul.f32 1.442695, %v1469_v14 }
 0x49b   : > { %v1462_v17 = vpop.xlane.xlu0 %1461  ;;  %v1465_v18 = vpop.xlane.xlu1 %1464 }
 0x49c   : > { %4707 = vpow2.f32 %v1473_v15  ;;  %v1470_v19 = vsub.f32 %v1301_v5, %v1462_v17  ;;  %v1471_v20 = vsub.f32 %v1377_v0, %v1465_v18 }
 0x49e   : > { %v1475_v21 = vmul.f32 1.442695, %v1470_v19  ;;  %v1477_v22 = vmul.f32 1.442695, %v1471_v20 }
 0x49f   : > { %v1468_v23 = vpop.xlane.xlu0 %1467  ;;  %v1005_v37 = vpop.permute.xlu1 %1004 }
 0x4a0   : > { %4709 = vpow2.f32 %v1475_v21  ;;  %v1472_v24 = vsub.f32 %v1453_v9, %v1468_v23 }
 0x4a1   : > { %4711 = vpow2.f32 %v1477_v22 }
 0x4a2   : > { %v1479_v25 = vmul.f32 1.442695, %v1472_v24 }
 0x4a4   : > { %4713 = vpow2.f32 %v1479_v25 }
 0x4a6   : > { %v5120_v26 = vpop.eup %4707 }
 0x4a7   : > { %v1481_v27 = vsel %vm1152_vm2, %v5120_v26, 0.0 }
 0x4a8   : > { %1482 = vadd.xlane.f32.xlu1 %v1481_v27 }
 0x4aa   : > { %v4710_v28 = vpop.eup %4709 }
 0x4ab   : > { %v5124_v32 = vpop.eup %4711  ;;  %v1484_v33 = vsel %vm1152_vm2, %v4710_v28, 0.0 }
 0x4ac   : > { %1485 = vadd.xlane.f32.xlu0 %v1484_v33  ;;  %v1487_v34 = vsel %vm1152_vm2, %v5124_v32, 0.0 }
 0x4ad   : > { %1488 = vadd.xlane.f32.xlu1 %v1487_v34 }
 0x4ae   : > { %v5129_v35 = vpop.eup %4713 }
 0x4af   : > { %v1490_v36 = vsel %vm1152_vm2, %v5129_v35, 0.0 }
 0x4b0   : > { %1491 = vadd.xlane.f32.xlu0 %v1490_v36 }
 0x4be   : > { %1008 = vrot.lane.b32.xlu1 %v5042_v30, %s5665_s28 }
 0x4c2   : > { %1010 = vrot.lane.b32.xlu1 %v5046_v31, %s5665_s28 }
 0x4c6   : > { %1006 = vrot.lane.b32.xlu0 %v5038_v29, %s5665_s28  ;;  %s5669_s28 = smov 8  }
 0x535   : > { %v1483_v38 = vpop.xlane.xlu1 %1482 }
 0x536   : > { %4715 = vrcp.f32 %v1483_v38 }
 0x539   : > { %v1486_v39 = vpop.xlane.xlu0 %1485 }
 0x53a   : > { %v1489_v40 = vpop.xlane.xlu1 %1488  ;;  %4717 = vrcp.f32 %v1486_v39 }
 0x53b   : > { %4719 = vrcp.f32 %v1489_v40 }
 0x53d   : > { %v1492_v41 = vpop.xlane.xlu0 %1491 }
 0x53e   : > { %v1009_v43 = vpop.permute.xlu1 %1008  ;;  %4721 = vrcp.f32 %v1492_v41 }
 0x53f   : > { %v1016_v44 = vcombine.low %v1005_v37, %v1009_v43  ;;  %v1017_v45 = vcombine.high %v1005_v37, %v1009_v43 }
 0x540   : > { %v4716_v7 = vpop.eup %4715 }
 0x541   : > { %v1007_v46 = vpop.permute.xlu0 %1006  ;;  %v1024_v30 = vrot.slane %v1016_v44, %v5054_v42  ;;  %v1031_v50 = vrot.slane %v1017_v45, %v5054_v42  ;;  %v1497_v20 = vmul.f32 %v4716_v7, %v5120_v26  ;;  %v1946_v26 = vld [vmem:[%s5694_s5] sm:$0xff] }
 0x542   : > { %v1011_v47 = vpop.permute.xlu1 %1010 }
 0x543   : > { %v1032_v48 = vcombine.low %v1007_v46, %v1011_v47  ;;  %v1033_v49 = vcombine.high %v1007_v46, %v1011_v47 }
 0x544   : > { %v4718_v11 = vpop.eup %4717 }
 0x545   : > { %v1040_v31 = vrot.slane %v1032_v48, %v5054_v42  ;;  %v1047_v29 = vrot.slane %v1033_v49, %v5054_v42  ;;  %v4720_v19 = vpop.eup %4719  ;;  %v1498_v21 = vmul.f32 %v4718_v11, %v4710_v28  ;;  %v1947_v28 = vld [vmem:[%s5694_s5 + $0x8] sm:$0xff] }
 0x546   : > { %v1499_v25 = vmul.f32 %v4720_v19, %v5124_v32  ;;  %v4585_v32 = vpack.c.bf16 %v1947_v28, %v1946_v26 }
 0x547   : > { %v1048_v52 = vcombine.low %v1024_v30, %v1040_v31  ;;  %v1049_v53 = vcombine.high %v1024_v30, %v1040_v31  ;;  %v1064_v54 = vcombine.low %v1031_v50, %v1047_v29  ;;  %v1065_v55 = vcombine.high %v1031_v50, %v1047_v29 }
 0x548   : > { %v4722_v22 = vpop.eup %4721 }
 0x549   : > { %v1056_v56 = vrot.slane %v1048_v52, %v5064_v51  ;;  %v1063_v57 = vrot.slane %v1049_v53, %v5064_v51  ;;  %v1072_v58 = vrot.slane %v1064_v54, %v5064_v51  ;;  %v1079_v59 = vrot.slane %v1065_v55, %v5064_v51  ;;  %v1948_v52 = vld [vmem:[%s5694_s5 + $0x10] sm:$0xff]  ;;  %v1949_v53 = vld [vmem:[%s5694_s5 + $0x18] sm:$0xff] }
 0x54a   : > { %v1500_v27 = vmul.f32 %v4722_v22, %v5129_v35 }
 0x54b   : > { %v1084_v60 = vcombine.low %v1056_v56, %v1063_v57  ;;  %v4192_v61 = vcombine.high %v1056_v56, %v1063_v57  ;;  %v1100_v62 = vcombine.low %v1072_v58, %v1079_v59  ;;  %v4193_v63 = vcombine.high %v1072_v58, %v1079_v59 }
 0x54c   : > { %v4588_v58 = vpack.c.bf16 %v1949_v53, %v1948_v52  ;;  %v2150_v52 = vld [vmem:[%s5653_s11 + $0x8] sm:$0xff] }
 0x54d   : > { %v1091_v0 = vrot.slane %v1084_v60, %v5054_v42  ;;  %v1099_v1 = vrot.slane %v4192_v61, %v5054_v42  ;;  %v1107_v2 = vrot.slane %v1100_v62, %v5054_v42  ;;  %v1115_v4 = vrot.slane %v4193_v63, %v5054_v42 }
 0x54f   : > { %v1116_v5 = vcombine.low %v1091_v0, %v1099_v1  ;;  %v1117_v6 = vcombine.high %v1091_v0, %v1099_v1  ;;  %v1132_v8 = vcombine.low %v1107_v2, %v1115_v4  ;;  %v1133_v9 = vcombine.high %v1107_v2, %v1115_v4 }
 0x551   : > { %v1124_v10 = vrot.slane %v1116_v5, %v5064_v51  ;;  %v1140_v12 = vrot.slane %v1132_v8, %v5064_v51  ;;  %v1131_v14 = vrot.slane %v1117_v6, %v5064_v51  ;;  %v1147_v15 = vrot.slane %v1133_v9, %v5064_v51 }
 0x553   : > { %v1148_v17 = vcombine.low %v1124_v10, %v1140_v12  ;;  %v1149_v18 = vcombine.high %v1124_v10, %v1140_v12  ;;  %v1150_v23 = vcombine.low %v1131_v14, %v1147_v15  ;;  %v1151_v24 = vcombine.high %v1131_v14, %v1147_v15 }
 0x555   : > { %4404 = vmatpush3.msra.mxu0 %v1148_v17  ;;  %4409 = vmatpush3.msra.mxu1 %v1149_v18 }
 0x556   : > { %4406 = vmatmul.mubr.msk.f32.vlgmr.msra.gmra.mrb[4].mxu0 %vm1152_vm2, %v1497_v20  ;;  %4411 = vmatmul.mubr.msk.f32.vlgmr.msra.gmra.mrb[6].mxu1 %vm1152_vm2, %v1498_v21 }
 0x557   : > { %4413 = vmatprep.subr.mxu0 %v4821_v16  ;;  %4418 = vmatprep.subr.mxu1 %v4821_v16 }
 0x558   : > { %4414 = vmatpush3.msra.mxu0 %v1150_v23  ;;  %4419 = vmatpush3.msra.mxu1 %v1151_v24  ;;  %v4208_v24 = vld [vmem:[%s5648_s6] ss:$0 sm:$0xff] }
 0x559   : > { %4415 = vmatprep.mubr.msk.f32.mxu0 %vm4820_vm1, %v4821_v16  ;;  %4420 = vmatprep.mubr.msk.f32.mxu1 %vm4820_vm1, %v4821_v16 }
 0x55a   : > { %4416 = vmatmul.mubr.msk.f32.vlgmr.msra.gmra.mrb[6].mxu0 %vm1152_vm2, %v1499_v25  ;;  %4421 = vmatmul.mubr.msk.f32.vlgmr.msra.gmra.mrb[8].mxu1 %vm1152_vm2, %v1500_v27 }
 0x55b   : > { %4584 = vmatprep.subr.bf16.mxu0 %v4819_v13  ;;  %4431 = vmatprep.mubr.msk.f32.mxu0 %vm4820_vm1, %v4821_v16 }
 0x55c   : > { %4590 = vmatprep.subr.bf16.mxu1 %v4819_v13  ;;  %4442 = vmatprep.mubr.msk.f32.mxu1 %vm4820_vm1, %v4821_v16 }
 0x55d   : > { %4586 = vmatpush3.bf16.msra.mxu0 %v4585_v32 }
 0x55e   : > { %4587 = vmatprep.subr.bf16.mxu0 %v4819_v13 }
 0x561   : > { %4589 = vmatpush3.bf16.msra.mxu0 %v4588_v58  ;;  %v2154_v58 = vld [vmem:[%s5653_s11 + $0x28] sm:$0xff] }
 0x562   : > { %4596 = vmatprep.subr.bf16.mxu0 %v4819_v13 }
 0x629   : > { %v1570_v33 = vpop.f32.mrb[4].mxu0  ;;  %v1643_v34 = vpop.f32.mrb[6].mxu1 }
 0x62a   : > { %v4407_v35 = vpop.f32.mrb[5].mxu0  ;;  %v4412_v36 = vpop.f32.mrb[7].mxu1 }
 0x62d   : > { %v1716_v37 = vpop.f32.mrb[6].mxu0  ;;  %v1789_v38 = vpop.f32.mrb[8].mxu1 }
 0x62e   : > { %v1793_v39 = vcombine.low %v1570_v33, %v1716_v37  ;;  %v1794_v40 = vcombine.high %v1570_v33, %v1716_v37  ;;  %v1809_v41 = vcombine.low %v1643_v34, %v1789_v38  ;;  %v1810_v43 = vcombine.high %v1643_v34, %v1789_v38  ;;  %v4417_v44 = vpop.f32.mrb[7].mxu0  ;;  %v4422_v45 = vpop.f32.mrb[9].mxu1  ;;  %v2060_v38 = vld [vmem:[%s5651_s9] sm:$0xff] }
 0x630   : > { %v1801_v46 = vrot.slane %v1793_v39, %v5054_v42  ;;  %v1808_v47 = vrot.slane %v1794_v40, %v5054_v42  ;;  %v1817_v48 = vrot.slane %v1809_v41, %v5054_v42  ;;  %v1824_v49 = vrot.slane %v1810_v43, %v5054_v42  ;;  %v2061_v39 = vld [vmem:[%s5651_s9 + $0x8] sm:$0xff]  ;;  %v2063_v41 = vld [vmem:[%s5651_s9 + $0x18] sm:$0xff] }
 0x631   : > { %v4591_v40 = vpack.c.bf16 %v2061_v39, %v2060_v38 }
 0x632   : > { %v1825_v30 = vcombine.low %v1801_v46, %v1817_v48  ;;  %v1826_v50 = vcombine.high %v1801_v46, %v1817_v48  ;;  %v1841_v31 = vcombine.low %v1808_v47, %v1824_v49  ;;  %v1842_v29 = vcombine.high %v1808_v47, %v1824_v49  ;;  %v4210_v48 = vld [vmem:[%s5649_s7] ss:$0 sm:$0xff] }
 0x633   : > { %4592 = vmatpush3.bf16.msra.mxu1 %v4591_v40 }
 0x634   : > { %v1833_v54 = vrot.slane %v1825_v30, %v5064_v51  ;;  %v1840_v55 = vrot.slane %v1826_v50, %v5064_v51  ;;  %v1849_v56 = vrot.slane %v1841_v31, %v5064_v51  ;;  %v1856_v57 = vrot.slane %v1842_v29, %v5064_v51  ;;  %4593 = vmatprep.subr.bf16.mxu1 %v4819_v13  ;;  %v4211_v30 = vld [vmem:[%s5650_s8] ss:$0 sm:$0xff] }
 0x635   : > { %v2149_v29 = vld [vmem:[%s5653_s11] sm:$0xff] }
 0x636   : > { %v1861_v59 = vcombine.low %v1833_v54, %v1840_v55  ;;  %v4206_v60 = vcombine.high %v1833_v54, %v1840_v55  ;;  %v1877_v61 = vcombine.low %v1849_v56, %v1856_v57  ;;  %v4207_v62 = vcombine.high %v1849_v56, %v1856_v57  ;;  %v2151_v54 = vld [vmem:[%s5653_s11 + $0x10] sm:$0xff]  ;;  %v2152_v55 = vld [vmem:[%s5653_s11 + $0x18] sm:$0xff]  ;;  %v2153_v57 = vld [vmem:[%s5653_s11 + $0x20] sm:$0xff] }
 0x637   : > { %v4597_v53 = vpack.c.bf16 %v2150_v52, %v2149_v29  ;;  %v4600_v56 = vpack.c.bf16 %v2152_v55, %v2151_v54 }
 0x638   : > { %v1868_v63 = vrot.slane %v1861_v59, %v5054_v42  ;;  %v1876_v0 = vrot.slane %v4206_v60, %v5054_v42  ;;  %v1884_v1 = vrot.slane %v1877_v61, %v5054_v42  ;;  %v1892_v2 = vrot.slane %v4207_v62, %v5054_v42  ;;  %v2155_v60 = vld [vmem:[%s5653_s11 + $0x30] sm:$0xff]  ;;  %v2156_v61 = vld [vmem:[%s5653_s11 + $0x38] sm:$0xff] }
 0x639   : > { %v4603_v59 = vpack.c.bf16 %v2154_v58, %v2153_v57  ;;  %v4606_v62 = vpack.c.bf16 %v2156_v61, %v2155_v60 }
 0x63a   : > { %v1894_v4 = vcombine.high %v1868_v63, %v1876_v0  ;;  %v1910_v5 = vcombine.high %v1884_v1, %v1892_v2  ;;  %v1893_v6 = vcombine.low %v1868_v63, %v1876_v0  ;;  %v1909_v7 = vcombine.low %v1884_v1, %v1892_v2  ;;  %v4212_v63 = vld [vmem:[%s5652_s10] ss:$0 sm:$0xff] }
 0x63c   : > { %v1908_v8 = vrot.slane %v1894_v4, %v5064_v51  ;;  %v1924_v9 = vrot.slane %v1910_v5, %v5064_v51  ;;  %v1901_v10 = vrot.slane %v1893_v6, %v5064_v51  ;;  %v1917_v11 = vrot.slane %v1909_v7, %v5064_v51 }
 0x63e   : > { %v1927_v12 = vcombine.low %v1908_v8, %v1924_v9  ;;  %v1926_v14 = vcombine.high %v1901_v10, %v1917_v11  ;;  %v1928_v15 = vcombine.high %v1908_v8, %v1924_v9  ;;  %v1925_v17 = vcombine.low %v1901_v10, %v1917_v11  ;;  %v4214_v9 = vld [vmem:[%s5654_s12] ss:$0 sm:$0xff] }
 0x640   : > { %1934 = vrot.lane.b32.xlu1 %v1927_v12, %s5671_s25  ;;  %1930 = vrot.lane.b32.xlu0 %v1926_v14, %s5669_s28  ;;  %s5697_s28 = smov 104   ;;  %s5699_s25 = smov 64  }
 0x644   : > { %1938 = vrot.lane.b32.xlu0 %v1928_v15, %s5670_s1  ;;  %s5700_s1 = smov 16  }
 0x6b2   : > { %v1931_v18 = vpop.permute.xlu0 %1930  ;;  %v1935_v19 = vpop.permute.xlu1 %1934 }
 0x6b3   : > { %v1941_v20 = vsel %vm1152_vm2, %v1925_v17, %v1931_v18 }
 0x6b4   : > { %v1943_v22 = vsel %vm1942_vm3, %v1941_v20, %v1935_v19 }
 0x6b6   : > { %v1939_v21 = vpop.permute.xlu0 %1938 }
 0x6b7   : > { %v1945_v23 = vsel %vm1944_vm4, %v1943_v22, %v1939_v21  ;;  %v4220_v22 = vld [vmem:[%s5691_s4 + $0x20] sm:$0xff] }
 0x6b8   : > { %4432 = vmatmul.mubr.msk.f32.vlgmr.msra.gmra.mrb[8].mxu0 %vm604_vm0, %v1945_v23  ;;  %v4221_v23 = vld [vmem:[%s5691_s4 + $0x28] sm:$0xff] }
 0x6b9   : > { %4461 = vmatprep.mubr.msk.f32.mxu0 %vm4820_vm1, %v4821_v16  ;;  %4598 = vmatpush3.bf16.msra.mxu0 %v4597_v53 }
 0x6ba   : > { %4599 = vmatprep.subr.bf16.mxu0 %v4819_v13 }
 0x6bd   : > { %4601 = vmatpush3.bf16.msra.mxu0 %v4600_v56 }
 0x6be   : > { %4602 = vmatprep.subr.bf16.mxu0 %v4819_v13 }
 0x6c1   : > { %4604 = vmatpush3.bf16.msra.mxu0 %v4603_v59 }
 0x6c2   : > { %4605 = vmatprep.subr.bf16.mxu0 %v4819_v13 }
 0x6c5   : > { %4607 = vmatpush3.bf16.msra.mxu0 %v4606_v62 }
 0x6c6   : > { %4485 = vmatprep.subr.mxu0 %v4821_v16 }
 0x78b   : > { %v2026_v25 = vpop.f32.mrb[8].mxu0 }
 0x78c   : > { %v2027_v27 = vadd.f32 %v4208_v24, %v2026_v25  ;;  %v4433_v26 = vpop.f32.mrb[9].mxu0  ;;  %v4609_v24 = vpack.c.bf16 %v4221_v23, %v4220_v22  ;;  %v4222_v25 = vld [vmem:[%s5691_s4 + $0x30] sm:$0xff] }
 0x78e   : > { %v2030_v28 = vadd.f32 %v2027_v27, %v4993_v3  ;;  %v2062_v3 = vld [vmem:[%s5651_s9 + $0x10] sm:$0xff]  ;;  %v4223_v27 = vld [vmem:[%s5691_s4 + $0x38] sm:$0xff] }
 0x78f   : > { %v4594_v43 = vpack.c.bf16 %v2063_v41, %v2062_v3  ;;  %v4612_v26 = vpack.c.bf16 %v4223_v27, %v4222_v25 }
 0x790   : > { %v2033_v32 = vsel %vm604_vm0, %v2030_v28, 0.0 }
 0x791   : > { %2034 = vadd.xlane.f32.xlu1 %v2033_v32  ;;  %4595 = vmatpush3.bf16.msra.mxu1 %v4594_v43 }
 0x792   : > { %4608 = vmatprep.subr.bf16.mxu1 %v4819_v13 }
 0x81e   : > { %v2035_v33 = vpop.xlane.xlu1 %2034 }
 0x81f   : > { %v2036_v34 = vmul.f32 0.03125, %v2035_v33 }
 0x821   : > { %v2037_v35 = vsub.f32 %v2030_v28, %v2036_v34 }
 0x823   : > { %v2038_v36 = vmul.f32 %v2037_v35, %v2037_v35 }
 0x825   : > { %v2039_v37 = vsel %vm604_vm0, %v2038_v36, 0.0 }
 0x826   : > { %2040 = vadd.xlane.f32.xlu0 %v2039_v37  ;;  %v4219_v37 = vld [vmem:[%s5693_s29 + $0x1] ss:$0 sm:$0xff] }
 0x8b3   : > { %v2041_v44 = vpop.xlane.xlu0 %2040 }
 0x8b4   : > { %v2042_v45 = vmul.f32 0.03125, %v2041_v44 }
 0x8b6   : > { %v2043_v46 = vadd.f32 1e-05, %v2042_v45 }
 0x8b8   : > { %4723 = vrsqrt.f32 %v2043_v46 }
 0x8c2   : > { %v4724_v47 = vpop.eup %4723 }
 0x8c3   : > { %v2045_v49 = vmul.f32 %v4724_v47, %v2037_v35  ;;  %v4218_v35 = vld [vmem:[%s5692_s0 + $0x1] ss:$0 sm:$0xff] }
 0x8c5   : > { %v2052_v50 = vmul.f32 %v4210_v48, %v2045_v49 }
 0x8c7   : > { %v2059_v31 = vadd.f32 %v4211_v30, %v2052_v50 }
 0x8c9   : > { %4443 = vmatmul.mubr.msk.f32.vlgmr.msra.gmra.mrb[10].mxu1 %vm604_vm0, %v2059_v31 }
 0x8ca   : > { %4472 = vmatprep.mubr.msk.f32.mxu1 %vm4820_vm1, %v4821_v16  ;;  %4610 = vmatpush3.bf16.msra.mxu1 %v4609_v24 }
 0x8cb   : > { %4611 = vmatprep.subr.bf16.mxu1 %v4819_v13 }
 0x8ce   : > { %4613 = vmatpush3.bf16.msra.mxu1 %v4612_v26 }
 0x8cf   : > { %4475 = vmatprep.subr.mxu1 %v4821_v16 }
 0x99c   : > { %v2140_v0 = vpop.f32.mrb[10].mxu1 }
 0x99d   : > { %v2141_v1 = vadd.f32 %v4212_v63, %v2140_v0  ;;  %v4444_v2 = vpop.f32.mrb[11].mxu1 }
 0x99f   : > { %v2145_v4 = vmul.f32 0.70710677, %v2141_v1  ;;  %v2144_v6 = vmul.f32 0.5, %v2141_v1 }
 0x9a1   : > { %4725 = verf.f32 %v2145_v4 }
 0x9ab   : > { %v4726_v5 = vpop.eup %4725 }
 0x9ac   : > { %v2147_v7 = vadd.f32 1.0, %v4726_v5 }
 0x9ae   : > { %v2148_v8 = vmul.f32 %v2147_v7, %v2144_v6 }
 0x9b0   : > { %4462 = vmatmul.mubr.msk.f32.vlgmr.msra.gmra.mrb[10].mxu0 %vm2164_vm5, %v2148_v8 }
 0x9b1   : > { %4487 = vmatprep.mubr.msk.f32.mxu0 %vm4820_vm1, %v4821_v16 }
 0xa83   : > { %v2234_v10 = vpop.f32.mrb[10].mxu0 }
 0xa84   : > { %v2235_v11 = vadd.f32 %v4214_v9, %v2234_v10  ;;  %v4463_v12 = vpop.f32.mrb[11].mxu0 }
 0xa86   : > { %v5279_v14 = vadd.f32 %v2235_v11, %v2059_v31 }
 0xa88   : > { %v2243_v15 = vsel %vm604_vm0, %v5279_v14, 0.0 }
 0xa89   : > { %2244 = vadd.xlane.f32.xlu0 %v2243_v15 }
 0xb16   : > { %v2245_v17 = vpop.xlane.xlu0 %2244 }
 0xb17   : > { %v2246_v18 = vmul.f32 0.03125, %v2245_v17 }
 0xb19   : > { %v2247_v19 = vsub.f32 %v5279_v14, %v2246_v18 }
 0xb1b   : > { %v2248_v20 = vmul.f32 %v2247_v19, %v2247_v19 }
 0xb1d   : > { %v2249_v21 = vsel %vm604_vm0, %v2248_v20, 0.0 }
 0xb1e   : > { %2250 = vadd.xlane.f32.xlu1 %v2249_v21 }
 0xbab   : > { %v2251_v28 = vpop.xlane.xlu1 %2250 }
 0xbac   : > { %v2252_v32 = vmul.f32 0.03125, %v2251_v28 }
 0xbae   : > { %v2253_v33 = vadd.f32 1e-05, %v2252_v32 }
 0xbb0   : > { %4727 = vrsqrt.f32 %v2253_v33 }
 0xbba   : > { %v4728_v34 = vpop.eup %4727 }
 0xbbb   : > { %v2255_v36 = vmul.f32 %v4728_v34, %v2247_v19 }
 0xbbd   : > { %v2262_v38 = vmul.f32 %v4218_v35, %v2255_v36 }
 0xbbf   : > { %v2269_v39 = vadd.f32 %v4219_v37, %v2262_v38 }
 0xbc1   : > { %4473 = vmatmul.mubr.msk.f32.vlgmr.msra.gmra.mrb[12].mxu1 %vm604_vm0, %v2269_v39 }
 0xbc2   : > { %4477 = vmatprep.mubr.msk.f32.mxu1 %vm4820_vm1, %v4821_v16 }
 0xc94   : > { %v5308_v40 = vpop.f32.mrb[12].mxu1 }
 0xc95   : > { %2352 = vrot.lane.b32.xlu1 %v5308_v40, %s5695_s23  ;;  %2349 = vrot.lane.b32.xlu0 %v5308_v40, %s5696_s24  ;;  %v4474_v3 = vpop.f32.mrb[13].mxu1  ;;  %s4279_s24 = sshll.u32 %s4958_s16, 4  ;;  %s4833_s16 = smov [#allocation3]  }
 0xc96   : > { %s5600_s0 = scalar_lea.hbm %s5661_s19, %s4279_s24  ;;  %s4759_s4 = sshll.u32 %s4833_s16, 4  ;;  %s4760_s4 = int_to_ptr.vmem [resolvable:$false] %s4759_s4 }
 0xc99   : > { %2355 = vrot.lane.b32.xlu1 %v5308_v40, %s5697_s28  ;;  %2494 = vrot.lane.b32.xlu0 %v5308_v40, %s5698_s3 }
 0xd07   : > { %v5318_v41 = vpop.permute.xlu1 %2352  ;;  %v5320_v43 = vpop.permute.xlu0 %2349 }
 0xd08   : > { %2498 = vrot.lane.b32.xlu0 %v5318_v41, %s5698_s3  ;;  %2496 = vrot.lane.b32.xlu1 %v5320_v43, %s5698_s3  ;;  %v2358_v47 = vcombine.low %v5308_v40, %v5318_v41  ;;  %v2359_v48 = vcombine.high %v5308_v40, %v5318_v41 }
 0xd0a   : > { %v2366_v31 = vrot.slane %v2358_v47, %v5054_v42  ;;  %v2373_v29 = vrot.slane %v2359_v48, %v5054_v42 }
 0xd0b   : > { %v5326_v44 = vpop.permute.xlu1 %2355  ;;  %v2495_v50 = vpop.permute.xlu0 %2494 }
 0xd0c   : > { %2500 = vrot.lane.b32.xlu1 %v5326_v44, %s5698_s3  ;;  %v2374_v45 = vcombine.low %v5320_v43, %v5326_v44  ;;  %v2375_v46 = vcombine.high %v5320_v43, %v5326_v44 }
 0xd0e   : > { %v2382_v49 = vrot.slane %v2374_v45, %v5054_v42  ;;  %v2389_v30 = vrot.slane %v2375_v46, %v5054_v42 }
 0xd10   : > { %v2390_v52 = vcombine.low %v2366_v31, %v2382_v49  ;;  %v2391_v53 = vcombine.high %v2366_v31, %v2382_v49  ;;  %v2406_v54 = vcombine.low %v2373_v29, %v2389_v30  ;;  %v2407_v55 = vcombine.high %v2373_v29, %v2389_v30 }
 0xd12   : > { %v2398_v60 = vrot.slane %v2390_v52, %v5064_v51  ;;  %v2405_v61 = vrot.slane %v2391_v53, %v5064_v51  ;;  %v2414_v62 = vrot.slane %v2406_v54, %v5064_v51  ;;  %v2421_v63 = vrot.slane %v2407_v55, %v5064_v51 }
 0xd14   : > { %v2426_v8 = vcombine.low %v2398_v60, %v2405_v61  ;;  %v4225_v9 = vcombine.high %v2398_v60, %v2405_v61  ;;  %v2442_v10 = vcombine.low %v2414_v62, %v2421_v63  ;;  %v4226_v11 = vcombine.high %v2414_v62, %v2421_v63 }
 0xd16   : > { %v2433_v23 = vrot.slane %v2426_v8, %v5054_v42  ;;  %v2441_v24 = vrot.slane %v4225_v9, %v5054_v42  ;;  %v2449_v25 = vrot.slane %v2442_v10, %v5054_v42  ;;  %v2457_v27 = vrot.slane %v4226_v11, %v5054_v42 }
 0xd18   : > { %v2458_v38 = vcombine.low %v2433_v23, %v2441_v24  ;;  %v2474_v39 = vcombine.low %v2449_v25, %v2457_v27  ;;  %v2459_v3 = vcombine.high %v2433_v23, %v2441_v24  ;;  %v2475_v45 = vcombine.high %v2449_v25, %v2457_v27 }
 0xd1a   : > { %v2466_v52 = vrot.slane %v2458_v38, %v5064_v51  ;;  %v2482_v53 = vrot.slane %v2474_v39, %v5064_v51  ;;  %v2473_v54 = vrot.slane %v2459_v3, %v5064_v51  ;;  %v2489_v55 = vrot.slane %v2475_v45, %v5064_v51 }
 0xd1c   : > { %v2491_v61 = vcombine.high %v2466_v52, %v2482_v53  ;;  %v2493_v63 = vcombine.high %v2473_v54, %v2489_v55 }
 0xd7a   : > { %v2497_v56 = vpop.permute.xlu1 %2496  ;;  %v2499_v57 = vpop.permute.xlu0 %2498 }
 0xd7b   : > { %v2506_v58 = vcombine.low %v2495_v50, %v2499_v57  ;;  %v2507_v59 = vcombine.high %v2495_v50, %v2499_v57 }
 0xd7d   : > { %v2514_v4 = vrot.slane %v2506_v58, %v5054_v42  ;;  %v2521_v5 = vrot.slane %v2507_v59, %v5054_v42  ;;  %v2490_v58 = vcombine.low %v2466_v52, %v2482_v53  ;;  %v2492_v59 = vcombine.low %v2473_v54, %v2489_v55 }
 0xd7e   : > { %v2501_v0 = vpop.permute.xlu1 %2500 }
 0xd7f   : > { %v2522_v1 = vcombine.low %v2497_v56, %v2501_v0  ;;  %v2523_v2 = vcombine.high %v2497_v56, %v2501_v0 }
 0xd81   : > { %v2530_v6 = vrot.slane %v2522_v1, %v5054_v42  ;;  %v2537_v7 = vrot.slane %v2523_v2, %v5054_v42 }
 0xd83   : > { %v2538_v12 = vcombine.low %v2514_v4, %v2530_v6  ;;  %v2539_v15 = vcombine.high %v2514_v4, %v2530_v6  ;;  %v2554_v17 = vcombine.low %v2521_v5, %v2537_v7  ;;  %v2555_v18 = vcombine.high %v2521_v5, %v2537_v7 }
 0xd85   : > { %v2546_v19 = vrot.slane %v2538_v12, %v5064_v51  ;;  %v2553_v20 = vrot.slane %v2539_v15, %v5064_v51  ;;  %v2562_v21 = vrot.slane %v2554_v17, %v5064_v51  ;;  %v2569_v22 = vrot.slane %v2555_v18, %v5064_v51 }
 0xd87   : > { %v2574_v26 = vcombine.low %v2546_v19, %v2553_v20  ;;  %v4227_v28 = vcombine.high %v2546_v19, %v2553_v20  ;;  %v2590_v32 = vcombine.low %v2562_v21, %v2569_v22  ;;  %v4228_v33 = vcombine.high %v2562_v21, %v2569_v22 }
 0xd89   : > { %v2581_v34 = vrot.slane %v2574_v26, %v5054_v42  ;;  %v2589_v35 = vrot.slane %v4227_v28, %v5054_v42  ;;  %v2597_v36 = vrot.slane %v2590_v32, %v5054_v42  ;;  %v2605_v37 = vrot.slane %v4228_v33, %v5054_v42 }
 0xd8b   : > { %v2606_v46 = vcombine.low %v2581_v34, %v2589_v35  ;;  %v2607_v47 = vcombine.high %v2581_v34, %v2589_v35  ;;  %v2622_v48 = vcombine.low %v2597_v36, %v2605_v37  ;;  %v2623_v49 = vcombine.high %v2597_v36, %v2605_v37 }
 0xd8d   : > { %v2614_v30 = vrot.slane %v2606_v46, %v5064_v51  ;;  %v2630_v50 = vrot.slane %v2622_v48, %v5064_v51  ;;  %v2621_v31 = vrot.slane %v2607_v47, %v5064_v51  ;;  %v2637_v29 = vrot.slane %v2623_v49, %v5064_v51 }
 0xd8f   : > { %v2638_v56 = vcombine.low %v2614_v30, %v2630_v50  ;;  %v2640_v57 = vcombine.low %v2621_v31, %v2637_v29  ;;  %v2639_v60 = vcombine.high %v2614_v30, %v2630_v50  ;;  %v2641_v62 = vcombine.high %v2621_v31, %v2637_v29 }
 0xd91   : > { %4476 = vmatpush3.xpose.msk.msra.mxu1 %vm1152_vm2, %v2638_v56  ;;  %4486 = vmatpush3.xpose.msk.msra.mxu0 %vm1152_vm2, %v2640_v57 }
 0xd92   : > { %4480 = vmatprep.subr.mxu1 %v4821_v16  ;;  %4495 = vmatprep.subr.mxu0 %v4821_v16 }
 0xd94   : > { %4478 = vmatmul.mubr.msk.f32.vlgmr.msra.gmra.mrb[14].mxu1 %vm1152_vm2, %v2490_v58  ;;  %4488 = vmatmul.mubr.msk.f32.vlgmr.msra.gmra.mrb[12].mxu0 %vm1152_vm2, %v2492_v59 }
 0xd95   : > { %4481 = vmatpush3.xpose.msk.msra.mxu1 %vm1152_vm2, %v2639_v60  ;;  %4482 = vmatprep.mubr.msk.f32.mxu1 %vm4820_vm1, %v4821_v16 }
 0xd96   : > { %4490 = vmatprep.subr.mxu1 %v4821_v16  ;;  %4497 = vmatprep.mubr.msk.f32.mxu0 %vm4820_vm1, %v4821_v16 }
 0xd98   : > { %4483 = vmatmul.mubr.msk.f32.vlgmr.msra.gmra.mrb[16].mxu1 %vm1152_vm2, %v2491_v61 }
 0xd99   : > { %4491 = vmatpush3.xpose.msk.msra.mxu1 %vm1152_vm2, %v2641_v62  ;;  %4492 = vmatprep.mubr.msk.f32.mxu1 %vm4820_vm1, %v4821_v16 }
 0xd9a   : > { %4500 = vmatprep.subr.mxu1 %v4821_v16 }
 0xd9c   : > { %4493 = vmatmul.mubr.msk.f32.vlgmr.msra.gmra.mrb[18].mxu1 %vm1152_vm2, %v2493_v63 }
 0xd9d   : > { %4502 = vmatprep.mubr.msk.f32.mxu1 %vm4820_vm1, %v4821_v16 }
 0xe67   : > { %v2862_v0 = vpop.f32.mrb[14].mxu1  ;;  %v3014_v1 = vpop.f32.mrb[12].mxu0 }
 0xe68   : > { %v4479_v2 = vpop.f32.mrb[15].mxu1  ;;  %v4489_v4 = vpop.f32.mrb[13].mxu0  ;;  %v3094_v5 = vsel %vm1152_vm2, %v2862_v0, -inf  ;;  %v3100_v9 = vsel %vm1152_vm2, %v3014_v1, -inf }
 0xe69   : > { %3095 = vmax.xlane.f32.xlu0 %v3094_v5 }
 0xe6b   : > { %v2938_v6 = vpop.f32.mrb[16].mxu1 }
 0xe6c   : > { %v4484_v7 = vpop.f32.mrb[17].mxu1  ;;  %v3097_v8 = vsel %vm1152_vm2, %v2938_v6, -inf }
 0xe6d   : > { %3098 = vmax.xlane.f32.xlu1 %v3097_v8  ;;  %3101 = vmax.xlane.f32.xlu0 %v3100_v9 }
 0xe6f   : > { %v3090_v10 = vpop.f32.mrb[18].mxu1 }
 0xe70   : > { %v4494_v11 = vpop.f32.mrb[19].mxu1  ;;  %v3103_v12 = vsel %vm1152_vm2, %v3090_v10, -inf }
 0xe71   : > { %3104 = vmax.xlane.f32.xlu0 %v3103_v12 }
 0xe7e   : > { %2642 = vrot.lane.b32.xlu1 %v5308_v40, %s5699_s25 }
 0xef6   : > { %v3096_v15 = vpop.xlane.xlu0 %3095 }
 0xef7   : > { %v3106_v17 = vsub.f32 %v2862_v0, %v3096_v15 }
 0xef9   : > { %v3110_v18 = vmul.f32 1.442695, %v3106_v17 }
 0xefa   : > { %v3099_v19 = vpop.xlane.xlu1 %3098  ;;  %v3102_v20 = vpop.xlane.xlu0 %3101 }
 0xefb   : > { %4729 = vpow2.f32 %v3110_v18  ;;  %v3107_v21 = vsub.f32 %v2938_v6, %v3099_v19  ;;  %v3108_v22 = vsub.f32 %v3014_v1, %v3102_v20 }
 0xefd   : > { %v3112_v23 = vmul.f32 1.442695, %v3107_v21  ;;  %v3114_v24 = vmul.f32 1.442695, %v3108_v22 }
 0xefe   : > { %v3105_v25 = vpop.xlane.xlu0 %3104  ;;  %v2643_v38 = vpop.permute.xlu1 %2642 }
 0xeff   : > { %4731 = vpow2.f32 %v3112_v23  ;;  %v3109_v27 = vsub.f32 %v3090_v10, %v3105_v25 }
 0xf00   : > { %4733 = vpow2.f32 %v3114_v24 }
 0xf01   : > { %v3116_v26 = vmul.f32 1.442695, %v3109_v27 }
 0xf03   : > { %4735 = vpow2.f32 %v3116_v26 }
 0xf05   : > { %v5396_v28 = vpop.eup %4729 }
 0xf06   : > { %v3118_v40 = vsel %vm1152_vm2, %v5396_v28, 0.0 }
 0xf07   : > { %3119 = vadd.xlane.f32.xlu1 %v3118_v40 }
 0xf09   : > { %v4732_v32 = vpop.eup %4731 }
 0xf0a   : > { %v5400_v33 = vpop.eup %4733  ;;  %v3121_v34 = vsel %vm1152_vm2, %v4732_v32, 0.0 }
 0xf0b   : > { %3122 = vadd.xlane.f32.xlu0 %v3121_v34  ;;  %v3124_v35 = vsel %vm1152_vm2, %v5400_v33, 0.0 }
 0xf0c   : > { %3125 = vadd.xlane.f32.xlu1 %v3124_v35 }
 0xf0d   : > { %v5405_v36 = vpop.eup %4735 }
 0xf0e   : > { %v3127_v37 = vsel %vm1152_vm2, %v5405_v36, 0.0 }
 0xf0f   : > { %3128 = vadd.xlane.f32.xlu0 %v3127_v37 }
 0xf1d   : > { %2646 = vrot.lane.b32.xlu1 %v5318_v41, %s5699_s25 }
 0xf21   : > { %2648 = vrot.lane.b32.xlu1 %v5326_v44, %s5699_s25 }
 0xf25   : > { %2644 = vrot.lane.b32.xlu0 %v5320_v43, %s5699_s25 }
 0xf94   : > { %v3120_v39 = vpop.xlane.xlu1 %3119 }
 0xf95   : > { %4737 = vrcp.f32 %v3120_v39 }
 0xf98   : > { %v3123_v3 = vpop.xlane.xlu0 %3122 }
 0xf99   : > { %v3126_v45 = vpop.xlane.xlu1 %3125  ;;  %4739 = vrcp.f32 %v3123_v3 }
 0xf9a   : > { %4741 = vrcp.f32 %v3126_v45 }
 0xf9c   : > { %v3129_v46 = vpop.xlane.xlu0 %3128 }
 0xf9d   : > { %v2647_v47 = vpop.permute.xlu1 %2646  ;;  %4743 = vrcp.f32 %v3129_v46 }
 0xf9e   : > { %v2654_v48 = vcombine.low %v2643_v38, %v2647_v47  ;;  %v2655_v49 = vcombine.high %v2643_v38, %v2647_v47 }
 0xf9f   : > { %v4738_v8 = vpop.eup %4737 }
 0xfa0   : > { %v2645_v30 = vpop.permute.xlu0 %2644  ;;  %v2662_v41 = vrot.slane %v2654_v48, %v5054_v42  ;;  %v2669_v52 = vrot.slane %v2655_v49, %v5054_v42  ;;  %v3134_v22 = vmul.f32 %v4738_v8, %v5396_v28  ;;  %v4245_v28 = vld [vmem:[%s5694_s5 + $0x20] sm:$0xff] }
 0xfa1   : > { %v2649_v50 = vpop.permute.xlu1 %2648 }
 0xfa2   : > { %v2670_v31 = vcombine.low %v2645_v30, %v2649_v50  ;;  %v2671_v29 = vcombine.high %v2645_v30, %v2649_v50 }
 0xfa3   : > { %v4740_v12 = vpop.eup %4739 }
 0xfa4   : > { %v2678_v44 = vrot.slane %v2670_v31, %v5054_v42  ;;  %v2685_v43 = vrot.slane %v2671_v29, %v5054_v42  ;;  %v4742_v21 = vpop.eup %4741  ;;  %v3135_v23 = vmul.f32 %v4740_v12, %v4732_v32  ;;  %v4246_v32 = vld [vmem:[%s5694_s5 + $0x28] sm:$0xff] }
 0xfa5   : > { %v3136_v26 = vmul.f32 %v4742_v21, %v5400_v33  ;;  %v4615_v33 = vpack.c.bf16 %v4246_v32, %v4245_v28 }
 0xfa6   : > { %v2686_v53 = vcombine.low %v2662_v41, %v2678_v44  ;;  %v2687_v54 = vcombine.high %v2662_v41, %v2678_v44  ;;  %v2702_v55 = vcombine.low %v2669_v52, %v2685_v43  ;;  %v2703_v56 = vcombine.high %v2669_v52, %v2685_v43 }
 0xfa7   : > { %v4744_v24 = vpop.eup %4743 }
 0xfa8   : > { %v2694_v57 = vrot.slane %v2686_v53, %v5064_v51  ;;  %v2701_v58 = vrot.slane %v2687_v54, %v5064_v51  ;;  %v2710_v59 = vrot.slane %v2702_v55, %v5064_v51  ;;  %v2717_v60 = vrot.slane %v2703_v56, %v5064_v51  ;;  %v4247_v53 = vld [vmem:[%s5694_s5 + $0x30] sm:$0xff]  ;;  %v4248_v54 = vld [vmem:[%s5694_s5 + $0x38] sm:$0xff]  ;;  %s4761_s5 = scalar_lea.vmem %s4760_s4, 32 }
 0xfa9   : > { %v3137_v40 = vmul.f32 %v4744_v24, %v5405_v36 }
 0xfaa   : > { %v2722_v61 = vcombine.low %v2694_v57, %v2701_v58  ;;  %v4229_v62 = vcombine.high %v2694_v57, %v2701_v58  ;;  %v2738_v63 = vcombine.low %v2710_v59, %v2717_v60  ;;  %v4230_v0 = vcombine.high %v2710_v59, %v2717_v60 }
 0xfab   : > { %v4618_v59 = vpack.c.bf16 %v4248_v54, %v4247_v53  ;;  %v4265_v53 = vld [vmem:[%s5653_s11 + $0x50] sm:$0xff]  ;;  %v4266_v54 = vld [vmem:[%s5653_s11 + $0x58] sm:$0xff] }
 0xfac   : > { %v2729_v1 = vrot.slane %v2722_v61, %v5054_v42  ;;  %v2737_v2 = vrot.slane %v4229_v62, %v5054_v42  ;;  %v2745_v4 = vrot.slane %v2738_v63, %v5054_v42  ;;  %v2753_v5 = vrot.slane %v4230_v0, %v5054_v42 }
 0xfae   : > { %v2754_v6 = vcombine.low %v2729_v1, %v2737_v2  ;;  %v2755_v7 = vcombine.high %v2729_v1, %v2737_v2  ;;  %v2770_v9 = vcombine.low %v2745_v4, %v2753_v5  ;;  %v2771_v10 = vcombine.high %v2745_v4, %v2753_v5 }
 0xfb0   : > { %v2762_v11 = vrot.slane %v2754_v6, %v5064_v51  ;;  %v2778_v15 = vrot.slane %v2770_v9, %v5064_v51  ;;  %v2769_v17 = vrot.slane %v2755_v7, %v5064_v51  ;;  %v2785_v18 = vrot.slane %v2771_v10, %v5064_v51 }
 0xfb2   : > { %v2786_v19 = vcombine.low %v2762_v11, %v2778_v15  ;;  %v2787_v20 = vcombine.high %v2762_v11, %v2778_v15  ;;  %v2788_v25 = vcombine.low %v2769_v17, %v2785_v18  ;;  %v2789_v27 = vcombine.high %v2769_v17, %v2785_v18 }
 0xfb4   : > { %4496 = vmatpush3.msra.mxu0 %v2786_v19  ;;  %4501 = vmatpush3.msra.mxu1 %v2787_v20 }
 0xfb5   : > { %4498 = vmatmul.mubr.msk.f32.vlgmr.msra.gmra.mrb[14].mxu0 %vm1152_vm2, %v3134_v22  ;;  %4503 = vmatmul.mubr.msk.f32.vlgmr.msra.gmra.mrb[20].mxu1 %vm1152_vm2, %v3135_v23 }
 0xfb6   : > { %4505 = vmatprep.subr.mxu0 %v4821_v16  ;;  %4510 = vmatprep.subr.mxu1 %v4821_v16 }
 0xfb7   : > { %4506 = vmatpush3.msra.mxu0 %v2788_v25  ;;  %4511 = vmatpush3.msra.mxu1 %v2789_v27 }
 0xfb8   : > { %4507 = vmatprep.mubr.msk.f32.mxu0 %vm4820_vm1, %v4821_v16  ;;  %4512 = vmatprep.mubr.msk.f32.mxu1 %vm4820_vm1, %v4821_v16 }
 0xfb9   : > { %4508 = vmatmul.mubr.msk.f32.vlgmr.msra.gmra.mrb[16].mxu0 %vm1152_vm2, %v3136_v26  ;;  %4513 = vmatmul.mubr.msk.f32.vlgmr.msra.gmra.mrb[22].mxu1 %vm1152_vm2, %v3137_v40 }
 0xfba   : > { %4614 = vmatprep.subr.bf16.mxu0 %v4819_v13  ;;  %4523 = vmatprep.mubr.msk.f32.mxu0 %vm4820_vm1, %v4821_v16 }
 0xfbb   : > { %4620 = vmatprep.subr.bf16.mxu1 %v4819_v13  ;;  %4534 = vmatprep.mubr.msk.f32.mxu1 %vm4820_vm1, %v4821_v16 }
 0xfbc   : > { %4616 = vmatpush3.bf16.msra.mxu0 %v4615_v33 }
 0xfbd   : > { %4617 = vmatprep.subr.bf16.mxu0 %v4819_v13 }
 0xfc0   : > { %4619 = vmatpush3.bf16.msra.mxu0 %v4618_v59  ;;  %v4269_v59 = vld [vmem:[%s5653_s11 + $0x70] sm:$0xff] }
 0xfc1   : > { %4626 = vmatprep.subr.bf16.mxu0 %v4819_v13 }
0x1088   : > { %v3207_v34 = vpop.f32.mrb[14].mxu0  ;;  %v3280_v35 = vpop.f32.mrb[20].mxu1 }
0x1089   : > { %v4499_v36 = vpop.f32.mrb[15].mxu0  ;;  %v4504_v37 = vpop.f32.mrb[21].mxu1 }
0x108a   : > { %v4256_v37 = vld [vmem:[%s5651_s9 + $0x20] sm:$0xff] }
0x108c   : > { %v3353_v38 = vpop.f32.mrb[16].mxu0  ;;  %v3426_v39 = vpop.f32.mrb[22].mxu1 }
0x108d   : > { %v3430_v3 = vcombine.low %v3207_v34, %v3353_v38  ;;  %v3431_v45 = vcombine.high %v3207_v34, %v3353_v38  ;;  %v3446_v46 = vcombine.low %v3280_v35, %v3426_v39  ;;  %v3447_v47 = vcombine.high %v3280_v35, %v3426_v39  ;;  %v4509_v48 = vpop.f32.mrb[17].mxu0  ;;  %v4514_v49 = vpop.f32.mrb[23].mxu1  ;;  %v4257_v38 = vld [vmem:[%s5651_s9 + $0x28] sm:$0xff] }
0x108e   : > { %v4621_v39 = vpack.c.bf16 %v4257_v38, %v4256_v37  ;;  %v4832_v37 = vmov 0   ;;  %v4276_v38 = vld [vmem:[#allocation2] ss:$0 sm:$0xff] }
0x108f   : > { %v3438_v30 = vrot.slane %v3430_v3, %v5054_v42  ;;  %v3445_v50 = vrot.slane %v3431_v45, %v5054_v42  ;;  %v3454_v31 = vrot.slane %v3446_v46, %v5054_v42  ;;  %v3461_v29 = vrot.slane %v3447_v47, %v5054_v42  ;;  %v4259_v3 = vld [vmem:[%s5651_s9 + $0x38] sm:$0xff]  ;;  %4703 = vset.pattern.permute.xlu0 %v4832_v37 }
0x1090   : > { %4622 = vmatpush3.bf16.msra.mxu1 %v4621_v39  ;;  %4704 = vset.pattern.permute.xlu1 %v4832_v37 }
0x1091   : > { %v3462_v41 = vcombine.low %v3438_v30, %v3454_v31  ;;  %v3463_v52 = vcombine.high %v3438_v30, %v3454_v31  ;;  %v3478_v44 = vcombine.low %v3445_v50, %v3461_v29  ;;  %v3479_v43 = vcombine.high %v3445_v50, %v3461_v29  ;;  %4623 = vmatprep.subr.bf16.mxu1 %v4819_v13  ;;  %v4254_v30 = vld [vmem:[%s5649_s7 + $0x1] ss:$0 sm:$0xff] }
0x1092   : > { %v4255_v31 = vld [vmem:[%s5650_s8 + $0x1] ss:$0 sm:$0xff] }
0x1093   : > { %v3470_v55 = vrot.slane %v3462_v41, %v5064_v51  ;;  %v3477_v56 = vrot.slane %v3463_v52, %v5064_v51  ;;  %v3486_v57 = vrot.slane %v3478_v44, %v5064_v51  ;;  %v3493_v58 = vrot.slane %v3479_v43, %v5064_v51  ;;  %v4263_v52 = vld [vmem:[%s5653_s11 + $0x40] sm:$0xff]  ;;  %v4264_v44 = vld [vmem:[%s5653_s11 + $0x48] sm:$0xff] }
0x1094   : > { %v4627_v43 = vpack.c.bf16 %v4264_v44, %v4263_v52 }
0x1095   : > { %v3498_v60 = vcombine.low %v3470_v55, %v3477_v56  ;;  %v4243_v61 = vcombine.high %v3470_v55, %v3477_v56  ;;  %v3514_v62 = vcombine.low %v3486_v57, %v3493_v58  ;;  %v4244_v63 = vcombine.high %v3486_v57, %v3493_v58  ;;  %v4267_v56 = vld [vmem:[%s5653_s11 + $0x60] sm:$0xff]  ;;  %v4268_v57 = vld [vmem:[%s5653_s11 + $0x68] sm:$0xff] }
0x1096   : > { %v4630_v55 = vpack.c.bf16 %v4266_v54, %v4265_v53  ;;  %v4633_v58 = vpack.c.bf16 %v4268_v57, %v4267_v56  ;;  %v4032_v54 = vld [vmem:[%s5659_s17] sm:$0xff]  ;;  %v4034_v56 = vld [vmem:[%s5659_s17 + $0x10] sm:$0xff] }
0x1097   : > { %v3505_v0 = vrot.slane %v3498_v60, %v5054_v42  ;;  %v3513_v1 = vrot.slane %v4243_v61, %v5054_v42  ;;  %v3521_v2 = vrot.slane %v3514_v62, %v5054_v42  ;;  %v3529_v4 = vrot.slane %v4244_v63, %v5054_v42  ;;  %v4270_v60 = vld [vmem:[%s5653_s11 + $0x78] sm:$0xff]  ;;  %v4261_v62 = vld [vmem:[%s5652_s10 + $0x1] ss:$0 sm:$0xff] }
0x1098   : > { %v4636_v61 = vpack.c.bf16 %v4270_v60, %v4269_v59 }
0x1099   : > { %v3531_v5 = vcombine.high %v3505_v0, %v3513_v1  ;;  %v3547_v6 = vcombine.high %v3521_v2, %v3529_v4  ;;  %v3530_v7 = vcombine.low %v3505_v0, %v3513_v1  ;;  %v3546_v8 = vcombine.low %v3521_v2, %v3529_v4 }
0x109b   : > { %v3545_v9 = vrot.slane %v3531_v5, %v5064_v51  ;;  %v3561_v10 = vrot.slane %v3547_v6, %v5064_v51  ;;  %v3538_v11 = vrot.slane %v3530_v7, %v5064_v51  ;;  %v3554_v12 = vrot.slane %v3546_v8, %v5064_v51  ;;  %v4250_v51 = vld [vmem:[%s5648_s6 + $0x1] ss:$0 sm:$0xff] }
0x109c   : > { %v4272_v8 = vld [vmem:[%s5654_s12 + $0x1] ss:$0 sm:$0xff] }
0x109d   : > { %v3564_v15 = vcombine.low %v3545_v9, %v3561_v10  ;;  %v3563_v17 = vcombine.high %v3538_v11, %v3554_v12  ;;  %v3565_v18 = vcombine.high %v3545_v9, %v3561_v10  ;;  %v3562_v19 = vcombine.low %v3538_v11, %v3554_v12 }
0x109f   : > { %3571 = vrot.lane.b32.xlu1 %v3564_v15, %s5700_s1  ;;  %3567 = vrot.lane.b32.xlu0 %v3563_v17, %s5701_s30  ;;  %s593_s30 = sand.u32 1, %s4809_s21  }
0x10a0   : > { %s594_s28 = scalar_lea.vmem [#allocation3], %s593_s30 }
0x10a1   : > { %s4125_s3 = sshll.u32 %s594_s28, 4  ;;  %s5602_s3 = int_to_ptr.vmem [resolvable:$true] %s4125_s3 }
0x10a2   : > { %s4755_s23 = scalar_lea.vmem %s5602_s3, 16  ;;  %p4762_p0 = scmp.lt.s32.totalorder %s5602_s3, %s4760_s4 }
0x10a3   : > { %3575 = vrot.lane.b32.xlu0 %v3565_v18, %s5702_s2  ;;  %s4113_s2 = scalar_lea.sflag [#allocation4], %s593_s30  ;;  %p4756_p11 = scmp.ne.s32.totalorder %s5602_s3, %s4755_s23 }
0x10a4   : > { %p4763_p1 = scmp.lt.s32.totalorder %s4761_s5, %s4755_s23 }
0x10a5   : > { %p4757_p12 = pnand %p4756_p11, %p4975_p5 }
0x10a6   : > { %p4764_p2 = por %p4763_p1, %p4762_p0 }
0x10a7   : > { %p4758_p13 = pneg %p4757_p12 }
0x10a9   : > { %p4765_p3 = pnand %p4764_p2, %p4758_p13 }
0x1111   : > { %v3568_v42 = vpop.permute.xlu0 %3567  ;;  %v3572_v20 = vpop.permute.xlu1 %3571 }
0x1112   : > { %v3578_v21 = vsel %vm1152_vm2, %v3562_v19, %v3568_v42 }
0x1113   : > { %v3579_v23 = vsel %vm1942_vm3, %v3578_v21, %v3572_v20  ;;  %v3910_v21 = vld [vmem:[%s5657_s15] sm:$0xff] }
0x1115   : > { %v3576_v22 = vpop.permute.xlu0 %3575 }
0x1116   : > { %v3580_v24 = vsel %vm1944_vm4, %v3579_v23, %v3576_v22  ;;  %v3911_v22 = vld [vmem:[%s5657_s15 + $0x8] sm:$0xff] }
0x1117   : > { %4524 = vmatmul.mubr.msk.f32.vlgmr.msra.gmra.mrb[18].mxu0 %vm604_vm0, %v3580_v24  ;;  %v4639_v23 = vpack.c.bf16 %v3911_v22, %v3910_v21  ;;  %v3912_v24 = vld [vmem:[%s5657_s15 + $0x10] sm:$0xff] }
0x1118   : > { %4553 = vmatprep.mubr.msk.f32.mxu0 %vm4820_vm1, %v4821_v16  ;;  %4628 = vmatpush3.bf16.msra.mxu0 %v4627_v43 }
0x1119   : > { %4629 = vmatprep.subr.bf16.mxu0 %v4819_v13 }
0x111c   : > { %4631 = vmatpush3.bf16.msra.mxu0 %v4630_v55  ;;  %v4033_v55 = vld [vmem:[%s5659_s17 + $0x8] sm:$0xff] }
0x111d   : > { %4632 = vmatprep.subr.bf16.mxu0 %v4819_v13  ;;  %v4645_v57 = vpack.c.bf16 %v4033_v55, %v4032_v54 }
0x1120   : > { %4634 = vmatpush3.bf16.msra.mxu0 %v4633_v58  ;;  %v4035_v58 = vld [vmem:[%s5659_s17 + $0x18] sm:$0xff] }
0x1121   : > { %4635 = vmatprep.subr.bf16.mxu0 %v4819_v13  ;;  %v4648_v60 = vpack.c.bf16 %v4035_v58, %v4034_v56 }
0x1124   : > { %4637 = vmatpush3.bf16.msra.mxu0 %v4636_v61 }
0x11ea   : > { %v3663_v25 = vpop.f32.mrb[18].mxu0 }
0x11eb   : > { %v3664_v27 = vadd.f32 %v4250_v51, %v3663_v25  ;;  %v4525_v26 = vpop.f32.mrb[19].mxu0  ;;  %v3913_v51 = vld [vmem:[%s5657_s15 + $0x18] sm:$0xff] }
0x11ec   : > { %v4642_v25 = vpack.c.bf16 %v3913_v51, %v3912_v24 }
0x11ed   : > { %v3667_v40 = vadd.f32 %v3664_v27, %v5279_v14  ;;  %v4258_v14 = vld [vmem:[%s5651_s9 + $0x30] sm:$0xff] }
0x11ee   : > { %v4624_v45 = vpack.c.bf16 %v4259_v3, %v4258_v14 }
0x11ef   : > { %v3672_v28 = vsel %vm604_vm0, %v3667_v40, 0.0 }
0x11f0   : > { %3673 = vadd.xlane.f32.xlu1 %v3672_v28  ;;  %4625 = vmatpush3.bf16.msra.mxu1 %v4624_v45 }
0x11f1   : > { %4638 = vmatprep.subr.bf16.mxu1 %v4819_v13 }
0x127d   : > { %v3674_v32 = vpop.xlane.xlu1 %3673 }
0x127e   : > { %v3675_v33 = vmul.f32 0.03125, %v3674_v32  ;;  %v4274_v32 = vld [vmem:[%s5655_s13] ss:$0 sm:$0xff] }
0x1280   : > { %v3676_v34 = vsub.f32 %v3667_v40, %v3675_v33 }
0x1282   : > { %v3677_v35 = vmul.f32 %v3676_v34, %v3676_v34 }
0x1284   : > { %v3678_v36 = vsel %vm604_vm0, %v3677_v35, 0.0 }
0x1285   : > { %3679 = vadd.xlane.f32.xlu0 %v3678_v36 }
0x1312   : > { %v3680_v46 = vpop.xlane.xlu0 %3679 }
0x1313   : > { %v3681_v47 = vmul.f32 0.03125, %v3680_v46 }
0x1315   : > { %v3682_v48 = vadd.f32 1e-05, %v3681_v47 }
0x1317   : > { %4745 = vrsqrt.f32 %v3682_v48 }
0x1321   : > { %v4746_v49 = vpop.eup %4745 }
0x1322   : > { %v3684_v50 = vmul.f32 %v4746_v49, %v3676_v34  ;;  %v4275_v34 = vld [vmem:[%s5656_s14] ss:$0 sm:$0xff] }
0x1324   : > { %v3691_v29 = vmul.f32 %v4254_v30, %v3684_v50 }
0x1326   : > { %v3698_v41 = vadd.f32 %v4255_v31, %v3691_v29 }
0x1328   : > { %4535 = vmatmul.mubr.msk.f32.vlgmr.msra.gmra.mrb[24].mxu1 %vm604_vm0, %v3698_v41 }
0x1329   : > { %4564 = vmatprep.mubr.msk.f32.mxu1 %vm4820_vm1, %v4821_v16  ;;  %4640 = vmatpush3.bf16.msra.mxu1 %v4639_v23 }
0x132a   : > { %4641 = vmatprep.subr.bf16.mxu1 %v4819_v13 }
0x132d   : > { %4643 = vmatpush3.bf16.msra.mxu1 %v4642_v25 }
0x132e   : > { %4644 = vmatprep.subr.bf16.mxu1 %v4819_v13 }
0x13fb   : > { %v3781_v63 = vpop.f32.mrb[24].mxu1 }
0x13fc   : > { %v3782_v0 = vadd.f32 %v4261_v62, %v3781_v63  ;;  %v4536_v1 = vpop.f32.mrb[25].mxu1 }
0x13fe   : > { %v3786_v2 = vmul.f32 0.70710677, %v3782_v0  ;;  %v3785_v5 = vmul.f32 0.5, %v3782_v0 }
0x1400   : > { %4747 = verf.f32 %v3786_v2 }
0x140a   : > { %v4748_v4 = vpop.eup %4747 }
0x140b   : > { %v3788_v6 = vadd.f32 1.0, %v4748_v4 }
0x140d   : > { %v3789_v7 = vmul.f32 %v3788_v6, %v3785_v5 }
0x140f   : > { %4554 = vmatmul.mubr.msk.f32.vlgmr.msra.gmra.mrb[20].mxu0 %vm2164_vm5, %v3789_v7 }
0x14e2   : > { %v3876_v9 = vpop.f32.mrb[20].mxu0 }
0x14e3   : > { %v3877_v10 = vadd.f32 %v4272_v8, %v3876_v9  ;;  %v4555_v11 = vpop.f32.mrb[21].mxu0 }
0x14e5   : > { %v3880_v12 = vadd.f32 %v3877_v10, %v3698_v41 }
0x14e7   : > { %v3883_v15 = vsel %vm604_vm0, %v3880_v12, 0.0 }
0x14e8   : > { %3884 = vadd.xlane.f32.xlu0 %v3883_v15 }
0x1575   : > { %v3885_v17 = vpop.xlane.xlu0 %3884 }
0x1576   : > { %v3886_v18 = vmul.f32 0.03125, %v3885_v17 }
0x1578   : > { %v3887_v19 = vsub.f32 %v3880_v12, %v3886_v18 }
0x157a   : > { %v3888_v42 = vmul.f32 %v3887_v19, %v3887_v19 }
0x157c   : > { %v3889_v20 = vsel %vm604_vm0, %v3888_v42, 0.0 }
0x157d   : > { %3890 = vadd.xlane.f32.xlu1 %v3889_v20 }
0x160a   : > { %v3891_v27 = vpop.xlane.xlu1 %3890 }
0x160b   : > { %v3892_v26 = vmul.f32 0.03125, %v3891_v27 }
0x160d   : > { %v3893_v40 = vadd.f32 1e-05, %v3892_v26 }
0x160f   : > { %4749 = vrsqrt.f32 %v3893_v40 }
0x1619   : > { %v4750_v28 = vpop.eup %4749 }
0x161a   : > { %v3895_v33 = vmul.f32 %v4750_v28, %v3887_v19 }
0x161c   : > { %v3902_v35 = vmul.f32 %v4274_v32, %v3895_v33 }
0x161e   : > { %v3909_v36 = vadd.f32 %v4275_v34, %v3902_v35 }
0x1620   : > { %4565 = vmatmul.mubr.msk.f32.vlgmr.msra.gmra.mrb[26].mxu1 %vm604_vm0, %v3909_v36 }
0x1621   : > { %4575 = vmatprep.mubr.msk.f32.mxu1 %vm4820_vm1, %v4821_v16  ;;  %4646 = vmatpush3.bf16.msra.mxu1 %v4645_v57 }
0x1622   : > { %4647 = vmatprep.subr.bf16.mxu1 %v4819_v13  ;;  %v4036_v13 = vld [vmem:[%s5660_s18] sm:$0x1] }
0x1625   : > { %4649 = vmatpush3.bf16.msra.mxu1 %v4648_v60 }
0x16f3   : > { %v3990_v39 = vpop.f32.mrb[26].mxu1 }
0x16f4   : > { %v3991_v14 = vadd.f32 %v4276_v38, %v3990_v39  ;;  %v4566_v3 = vpop.f32.mrb[27].mxu1 }
0x16f6   : > { %v3995_v45 = vsel %vm3994_vm6, %v3991_v14, -inf }
0x16f7   : > { %v3996_v46 = vrot.slane %v3995_v45, 4 }
0x16f9   : > { %v3997_v47 = vmax.f32 %v3995_v45, %v3996_v46 }
0x16fb   : > { %v3998_v48 = vrot.slane %v3997_v47, 2 }
0x16fd   : > { %v3999_v49 = vmax.f32 %v3997_v47, %v3998_v48 }
0x16ff   : > { %v4000_v30 = vrot.slane %v3999_v49, 1 }
0x1701   : > { %v4001_v50 = vmax.f32 %v3999_v49, %v4000_v30 }
0x1703   : > { %v4002_v31 = vsub.f32 %v3991_v14, %v4001_v50 }
0x1705   : > { %v4003_v29 = vmul.f32 1.442695, %v4002_v31 }
0x1707   : > { %4751 = vpow2.f32 %v4003_v29 }
0x1711   : > { %v4752_v41 = vpop.eup %4751 }
0x1712   : > { %v4018_v16 = vsel %vm3994_vm6, %v4752_v41, 0.0  ;;  %4007 = vperm.xlu0 %4703, %v4752_v41  }
0x1713   : > { %v4019_v52 = vrot.slane %v4018_v16, 4 }
0x1715   : > { %v4020_v44 = vadd.f32 %v4019_v52, %v4018_v16 }
0x1717   : > { %v4021_v43 = vrot.slane %v4020_v44, 2 }
0x1719   : > { %v4022_v53 = vadd.f32 %v4021_v43, %v4020_v44 }
0x171b   : > { %v4023_v59 = vrot.slane %v4022_v53, 1 }
0x171d   : > { %v4024_v61 = vadd.f32 %v4023_v59, %v4022_v53 }
0x171f   : > { %4753 = vrcp.f32 %v4024_v61 }
0x1729   : > { %v4754_v62 = vpop.eup %4753 }
0x172a   : > { %4028 = vperm.xlu1 %4704, %v4754_v62  }
0x1791   : > { %v4008_v63 = vpop.permute.xlu0 %4007 }
0x1792   : > { %v4010_v0 = vmul.f32 %v4008_v63, %v3909_v36 }
0x1794   : > { %v4011_v1 = vsel %vm604_vm0, %v4010_v0, 0.0 }
0x1795   : > { %v4012_v2 = vrot.slane %v4011_v1, 4 }
0x1797   : > { %v4013_v4 = vadd.f32 %v4012_v2, %v4011_v1 }
0x1799   : > { %v4014_v5 = vrot.slane %v4013_v4, 2 }
0x179b   : > { %v4015_v6 = vadd.f32 %v4014_v5, %v4013_v4 }
0x179d   : > { %v4016_v7 = vrot.slane %v4015_v6, 1 }
0x179f   : > { %v4017_v8 = vadd.f32 %v4016_v7, %v4015_v6 }
0x17a9   : > { %v4029_v9 = vpop.permute.xlu1 %4028 }
0x17aa   : > { %v4031_v10 = vmul.f32 %v4029_v9, %v4017_v8 }
0x17ac   : > { %4576 = vmatmul.mubr.msk.f32.vlgmr.msra.gmra.mrb[28].mxu1 %vm604_vm0, %v4031_v10 }
0x187f   : > { %v4106_v11 = vpop.f32.mrb[28].mxu1 }
0x1880   : > { %v4107_v12 = vadd.f32 %v4106_v11, %v4036_v13  ;;  %v4577_v15 = vpop.f32.mrb[29].mxu1 }
0x1882   : > { %4111 = vst.msk [vmem:[%s594_s28] sm:$0x1] %vm4110_vm7, %v4107_v12 }
0x1883   : > { %4768 = shalt.err (!%p4765_p3)
}
0x1884   : > { %s4769_s30 = scalar_lea.hbm %s5600_s0, 16  ;;  %s4773_s25 = scalar_lea.hbm %s5661_s19, 32 }
0x1885   : > { %p4770_p4 = scmp.ne.s32.totalorder %s5600_s0, %s4769_s30  ;;  %p4774_p9 = scmp.lt.u32.totalorder %s5600_s0, %s5661_s19 }
0x1886   : > { %p4775_p10 = scmp.lt.u32.totalorder %s4773_s25, %s4769_s30  ;;  %p4777_p12 = scmp.lt.u32.totalorder %s4769_s30, %s5600_s0 }
0x1887   : > { %p4771_p7 = pnand %p4770_p4, %p4975_p5 }
0x1888   : > { %p4776_p11 = por %p4775_p10, %p4774_p9 }
0x1889   : > { %p4772_p8 = pneg %p4771_p7 }
0x188a   : > { %p4778_p13 = por %p4777_p12, %p4776_p11 }
0x188c   : > { %p4779_p0 = pnand %p4778_p13, %p4772_p8 }
0x188e   : > { %4782 = shalt.err (!%p4779_p0)
}
0x188f   : > { %4650 = dma.vmem_to_hbm [thread:$0]  (%p4975_p5), %s5602_s3, 16, %s5600_s0, %s4113_s2  }
0x1890 PF: > { %p4656_p1 = scmp.ge.s32.totalorder %s4817_s22, 2  ;;  %s4137_s5 = sand.u32 1, %s4805_s20  }
0x1891   : > { %s4138_s23 = scalar_lea.sflag [#allocation4], %s4137_s5 }
0x1892   : > { %p4653_p2 = pnand %p4656_p1, %p4979_p6 }
0x1894   : > { %4800 = dma.done.wait (!%p4653_p2), %s4138_s23, 16  }
0x1895   : > { %4802 = vsyncadd (!%p4653_p2), %s4138_s23, 4294967280  ;;  %s5703_s22 = sld [smem:[#allocation7_spill]]  ;;  %s5704_s16 = sld [smem:[#allocation6_spill]] }
0x1896   : > { %s5705_s1 = sld [smem:[#allocation8_spill]]  ;;  %s5706_s20 = smov %s4809_s21 }
0x189b   : > { %p31_p3 = scmp.ge.s32.totalorder %s5703_s22, 4   ;;  %s5707_s21 = smov %s5704_s16 }
0x189d   :  { %33 = sbr.rel (!%p31_p3) target bundleno = 10 (0xa), region = 142 }
0x18a4   :  { %4142 = vsyncpa [#allocation4], 1 }
0x18a5   :  { %4144 = vsyncpa [#allocation4 + $0x1], 1 }

</bundles_post_ra>
